<compile_context>
chip_gen: v7x
topology: tpu7x:2x2x1
jax: 0.10.0
libtpu: 0.0.40
codegen_flags: <defaults>
</compile_context>

<pallas_src>
import jax
import jax.numpy as jnp
import numpy as np
from jax.experimental import pallas as pl
from jax.experimental.pallas import tpu as pltpu


def _gaussian_weights_1d(size: int, sigma: float) -> np.ndarray:
    """Normalized 1-D Gaussian taps; outer(g, g) equals the reference 2-D window."""
    start = size // 2
    end = start + (1 if size % 2 == 1 else 0)
    arr = np.arange(-start, end, dtype=np.float32)
    e = np.exp(-0.5 * arr * arr / np.float32(sigma) ** 2).astype(np.float32)
    return (e / e.sum()).astype(np.float32)


def _toeplitz_taps(g: np.ndarray, H: int, W: int):
    """Banded Toeplitz matrices so a valid 1-D conv becomes an MXU matmul.

    T_h[o, h] = g[h - o]   shape (OH, H)  -> H-pass is T_h @ X
    T_w[w, q] = g[w - q]   shape (W, OW)  -> W-pass is X @ T_w
    """
    K = g.shape[0]
    OH, OW = H - K + 1, W - K + 1
    t_h = np.zeros((OH, H), np.float32)
    for o in range(OH):
        t_h[o, o:o + K] = g
    t_w = np.zeros((W, OW), np.float32)
    for q in range(OW):
        t_w[q:q + K, q] = g
    return t_h, t_w


def _make_ssim_kernel(bt: int):
    def kernel(pred_ref, ref_ref, th_ref, tw_ref, sum_ref):
        pred = pred_ref[...].astype(jnp.float32)   # (Bt, C, H, W)
        refi = ref_ref[...].astype(jnp.float32)
        t_h = th_ref[...]                          # (OH, H) f32
        t_w = tw_ref[...]                          # (W, OW) f32
        _, _, H, W = pred.shape
        OH = t_h.shape[0]
        OW = t_w.shape[1]

        # Channel-summed moment maps (linearity of the channel-repeated conv
        # kernel), stacked on the leading dim: (5*Bt, H, W).
        maps = jnp.concatenate([
            jnp.sum(pred, axis=1),
            jnp.sum(refi, axis=1),
            jnp.sum(pred * pred, axis=1),
            jnp.sum(refi * refi, axis=1),
            jnp.sum(pred * refi, axis=1),
        ], axis=0)

        # ---- separable Gaussian valid conv, both passes on the MXU ----
        # W-pass: contract the lane dim with T_w -> (5*Bt*H, OW).
        yw = jnp.dot(maps.reshape(5 * bt * H, W), t_w,
                     preferred_element_type=jnp.float32,
                     precision=jax.lax.Precision.HIGHEST)
        yw = yw.reshape(5 * bt, H, OW)
        # H-pass: batched (OH, H) @ (H, OW) over the 5*Bt maps.
        t_h_b = jnp.broadcast_to(t_h[None], (5 * bt, OH, H))
        conv = jnp.einsum('moh,mhq->moq', t_h_b, yw,
                          preferred_element_type=jnp.float32,
                          precision=jax.lax.Precision.HIGHEST)  # (5*Bt, OH, OW)

        mu_x = conv[0 * bt:1 * bt]
        mu_y = conv[1 * bt:2 * bt]
        e_xx = conv[2 * bt:3 * bt]
        e_yy = conv[3 * bt:4 * bt]
        e_xy = conv[4 * bt:5 * bt]

        k1 = 0.01 ** 2
        k2 = 0.03 ** 2
        sigma_x_sq = e_xx - mu_x * mu_x
        sigma_y_sq = e_yy - mu_y * mu_y
        sigma_xy = e_xy - mu_x * mu_y
        cs = (2.0 * sigma_xy + k2) / (sigma_x_sq + sigma_y_sq + k2)
        sim = cs * (2.0 * mu_x * mu_y + k1) / (mu_x * mu_x + mu_y * mu_y + k1)

        # Reduce the SSIM map to a per-block scalar here; the mean / (1 - .)
        # finish is a tiny XLA reduce over the (nb, 1) partial sums.
        sum_ref[0, 0] = jnp.sum(sim)

    return kernel


def _pick_batch_block(B, C, H, W, OH, OW, in_bytes, budget_bytes):
    """Largest divisor of B (capped at 8) whose per-step VMEM fits the budget."""
    f32 = 4
    per_img = (
        2 * 2 * C * H * W * in_bytes      # two inputs x double-buffering
        + 5 * H * W * f32                 # moment maps
        + 5 * H * OW * f32                # W-pass result
        + 5 * OH * H * f32                # broadcast T_h for the batched matmul
        + 5 * OH * OW * f32               # conv result
        + 8 * OH * OW * f32               # elementwise SSIM temporaries
    )
    fixed = 2 * 2 * (OH * H + W * OW) * f32   # Toeplitz operands (double-buffered)
    avail = max(budget_bytes - fixed, per_img)
    max_bt = int(max(1, min(B, 8, avail // per_img)))
    bt = 1
    for d in range(1, max_bt + 1):
        if B % d == 0:
            bt = d
    return bt


def ssim_loss(pred_img, ref_img, sigma: float = 1.5):
    """Pallas implementation of SSIMLoss.forward (returns a scalar f32)."""
    if pred_img.ndim != 4 or ref_img.ndim != 4:
        raise ValueError("Image must have (batch, channel, height, width) dimensions")
    if pred_img.shape != ref_img.shape:
        raise ValueError("pred_img and ref_img must have the same shape")
    B, C, H, W = pred_img.shape
    r = int(3.5 * sigma + 0.5)
    ksize = 2 * r + 1                         # always odd
    if H < ksize or W < ksize:
        raise ValueError(f"Spatial dims must be >= kernel size {ksize}, got {(H, W)}")
    OH, OW = H - ksize + 1, W - ksize + 1

    g = _gaussian_weights_1d(ksize, sigma)
    t_h_np, t_w_np = _toeplitz_taps(g, H, W)
    t_h = jnp.asarray(t_h_np)
    t_w = jnp.asarray(t_w_np)

    in_bytes = jnp.dtype(pred_img.dtype).itemsize
    # ~40 MiB working budget keeps headroom under v7x's 64 MiB/TC VMEM; v5e/v6e
    # have 128 MiB physical so the same choice is safe there too.
    bt = _pick_batch_block(B, C, H, W, OH, OW, in_bytes, budget_bytes=40 * 2 ** 20)
    # TODO(synk): for very large images where even bt=1 exceeds the VMEM budget,
    # add an H-strip grid axis with a (ksize-1)-row halo (element-offset index
    # map) and per-strip partial sums instead of whole-image blocks.
    nb = B // bt

    partial = pl.pallas_call(
        _make_ssim_kernel(bt),
        out_shape=jax.ShapeDtypeStruct((nb, 1), jnp.float32),
        grid=(nb,),
        in_specs=[
            pl.BlockSpec((bt, C, H, W), lambda b: (b, 0, 0, 0)),
            pl.BlockSpec((bt, C, H, W), lambda b: (b, 0, 0, 0)),
            pl.BlockSpec((OH, H), lambda b: (0, 0)),   # Toeplitz taps, resident
            pl.BlockSpec((W, OW), lambda b: (0, 0)),
        ],
        out_specs=pl.BlockSpec((1, 1), lambda b: (b, 0),
                               memory_space=pltpu.MemorySpace.SMEM),
        compiler_params=pltpu.CompilerParams(
            dimension_semantics=("parallel",),
            vmem_limit_bytes=64 * 1024 * 1024,
        ),
    )(pred_img, ref_img, t_h, t_w)

    # Mean over the (B, 1, OH, OW) SSIM map, then 1 - SSIM.
    return 1.0 - jnp.sum(partial) / float(B * OH * OW)


# ----------------------------- pure-JAX reference -----------------------------

def _gaussian_kernel_2d(size: int, sigma: float) -> jnp.ndarray:
    start = size // 2
    end = start + (1 if size % 2 == 1 else 0)
    arr = jnp.arange(-start, end, dtype=jnp.float32)
    xx, yy = jnp.meshgrid(arr, arr, indexing="ij")
    k = jnp.exp(-0.5 * (xx ** 2 + yy ** 2) / (sigma ** 2))
    return k / jnp.sum(k)


def _ssim_loss_ref(pred, ref, sigma: float = 1.5):
    """Pure-JAX reference mirroring the PyTorch code (for correctness check)."""
    r = int(3.5 * sigma + 0.5)
    ks = 2 * r + 1
    kern2d = _gaussian_kernel_2d(ks, sigma)
    C = pred.shape[1]
    w = jnp.tile(kern2d[None, None], (1, C, 1, 1))          # (1, C, ks, ks)

    def conv(x):
        return jax.lax.conv_general_dilated(
            x, w, window_strides=(1, 1), padding="VALID",
            dimension_numbers=("NCHW", "OIHW", "NCHW"),
            precision=jax.lax.Precision.HIGHEST)

    k1, k2 = 0.01 ** 2, 0.03 ** 2
    mu_x, mu_y = conv(pred), conv(ref)
    sx = conv(pred * pred) - mu_x ** 2
    sy = conv(ref * ref) - mu_y ** 2
    sxy = conv(pred * ref) - mu_x * mu_y
    cs = (2 * sxy + k2) / (sx + sy + k2)
    sim = cs * (2 * mu_x * mu_y + k1) / (mu_x ** 2 + mu_y ** 2 + k1)
    return 1.0 - jnp.mean(sim)


if __name__ == "__main__":
    key = jax.random.PRNGKey(0)
    kp, kr = jax.random.split(key)
    B, C, H, W = 2, 4, 16, 16              # 16x16 spatial, 11x11 window -> 6x6 SSIM map
    pred = jax.random.uniform(kp, (B, C, H, W), dtype=jnp.float32)
    ref = jax.random.uniform(kr, (B, C, H, W), dtype=jnp.float32)

    loss = ssim_loss(pred, ref, sigma=1.5)
    loss = jax.block_until_ready(loss)

    ref_loss = _ssim_loss_ref(pred, ref, sigma=1.5)
    assert abs(float(loss) - float(ref_loss)) < 2e-3, (float(loss), float(ref_loss))

    print("KERNEL_OK")
</pallas_src>

<mosaic_0001>
module attributes {stable_mosaic.version = 11 : i64} {
  func.func @kernel(%arg0: i32, %arg1: memref<2x4x16x16xf32, #tpu.memory_space<vmem>>, %arg2: memref<2x4x16x16xf32, #tpu.memory_space<vmem>>, %arg3: memref<6x16xf32, #tpu.memory_space<vmem>>, %arg4: memref<16x6xf32, #tpu.memory_space<vmem>>, %arg5: memref<1x1xf32, #tpu.memory_space<smem>>) attributes {dimension_semantics = [#tpu.dimension_semantics<parallel>], iteration_bounds = array<i64: 1>, scalar_prefetch = 0 : i64, scratch_operands = 0 : i64, tpu.core_type = #tpu.core_type<tc>, window_params = [{transform_indices = @transform_0, window_bounds = array<i64: 2, 4, 16, 16>}, {transform_indices = @transform_1, window_bounds = array<i64: 2, 4, 16, 16>}, {pipeline_mode = #tpu.pipeline_mode<synchronous>, transform_indices = @transform_2, window_bounds = array<i64: 6, 16>}, {pipeline_mode = #tpu.pipeline_mode<synchronous>, transform_indices = @transform_3, window_bounds = array<i64: 16, 6>}, {transform_indices = @transform_4, window_bounds = array<i64: 1, 1>}]} {
    %c0 = arith.constant 0 : index
    %c0_0 = arith.constant 0 : index
    %c0_1 = arith.constant 0 : index
    %c0_2 = arith.constant 0 : index
    %0 = vector.load %arg1[%c0, %c0_0, %c0_1, %c0_2] : memref<2x4x16x16xf32, #tpu.memory_space<vmem>>, vector<2x4x16x16xf32>
    %c0_3 = arith.constant 0 : index
    %c0_4 = arith.constant 0 : index
    %c0_5 = arith.constant 0 : index
    %c0_6 = arith.constant 0 : index
    %1 = vector.load %arg2[%c0_3, %c0_4, %c0_5, %c0_6] : memref<2x4x16x16xf32, #tpu.memory_space<vmem>>, vector<2x4x16x16xf32>
    %c0_7 = arith.constant 0 : index
    %c0_8 = arith.constant 0 : index
    %2 = vector.load %arg3[%c0_7, %c0_8] : memref<6x16xf32, #tpu.memory_space<vmem>>, vector<6x16xf32>
    %c0_9 = arith.constant 0 : index
    %c0_10 = arith.constant 0 : index
    %3 = vector.load %arg4[%c0_9, %c0_10] : memref<16x6xf32, #tpu.memory_space<vmem>>, vector<16x6xf32>
    %cst = arith.constant dense<0.000000e+00> : vector<2x16x16xf32>
    %4 = vector.multi_reduction <add>, %0, %cst [1] : vector<2x4x16x16xf32> to vector<2x16x16xf32>
    %cst_11 = arith.constant dense<0.000000e+00> : vector<2x16x16xf32>
    %5 = vector.multi_reduction <add>, %1, %cst_11 [1] : vector<2x4x16x16xf32> to vector<2x16x16xf32>
    %6 = arith.mulf %0, %0 : vector<2x4x16x16xf32>
    %cst_12 = arith.constant dense<0.000000e+00> : vector<2x16x16xf32>
    %7 = vector.multi_reduction <add>, %6, %cst_12 [1] : vector<2x4x16x16xf32> to vector<2x16x16xf32>
    %8 = arith.mulf %1, %1 : vector<2x4x16x16xf32>
    %cst_13 = arith.constant dense<0.000000e+00> : vector<2x16x16xf32>
    %9 = vector.multi_reduction <add>, %8, %cst_13 [1] : vector<2x4x16x16xf32> to vector<2x16x16xf32>
    %10 = arith.mulf %0, %1 : vector<2x4x16x16xf32>
    %cst_14 = arith.constant dense<0.000000e+00> : vector<2x16x16xf32>
    %11 = vector.multi_reduction <add>, %10, %cst_14 [1] : vector<2x4x16x16xf32> to vector<2x16x16xf32>
    %12 = tpu.concatenate %4, %5, %7, %9, %11 in 0 : vector<2x16x16xf32>, vector<2x16x16xf32>, vector<2x16x16xf32>, vector<2x16x16xf32>, vector<2x16x16xf32> -> vector<10x16x16xf32>
    %13 = vector.shape_cast %12 : vector<10x16x16xf32> to vector<160x16xf32>
    %cst_15 = arith.constant dense<0.000000e+00> : vector<160x6xf32>
    %14 = tpu.matmul %13, %3, %cst_15 {dimension_numbers = #tpu.dot_dimension_numbers<[1], [0], [0], [1], [0, 0, 1, 1], [], []>, precision = #tpu.contract_precision<fp32>} : vector<160x16xf32>, vector<16x6xf32>, vector<160x6xf32> -> vector<160x6xf32>
    %15 = vector.shape_cast %14 : vector<160x6xf32> to vector<10x16x6xf32>
    %16 = vector.shape_cast %2 : vector<6x16xf32> to vector<1x6x16xf32>
    %17 = vector.shape_cast %16 : vector<1x6x16xf32> to vector<1x6x16xf32>
    %18 = vector.broadcast %17 : vector<1x6x16xf32> to vector<10x6x16xf32>
    "tpu.trace_start"() <{level = 10 : i32, message = "moh,mhq->moq"}> : () -> ()
    %cst_16 = arith.constant dense<0.000000e+00> : vector<10x6x6xf32>
    %19 = tpu.matmul %18, %15, %cst_16 {dimension_numbers = #tpu.dot_dimension_numbers<[2], [1], [1], [2], [0, 0, 0, 1, 1, 2], [0], [0]>, precision = #tpu.contract_precision<fp32>} : vector<10x6x16xf32>, vector<10x16x6xf32>, vector<10x6x6xf32> -> vector<10x6x6xf32>
    "tpu.trace_stop"() : () -> ()
    %20 = vector.extract_strided_slice %19 {offsets = [0, 0, 0], sizes = [2, 6, 6], strides = [1, 1, 1]} : vector<10x6x6xf32> to vector<2x6x6xf32>
    %21 = vector.extract_strided_slice %19 {offsets = [2, 0, 0], sizes = [2, 6, 6], strides = [1, 1, 1]} : vector<10x6x6xf32> to vector<2x6x6xf32>
    %22 = vector.extract_strided_slice %19 {offsets = [4, 0, 0], sizes = [2, 6, 6], strides = [1, 1, 1]} : vector<10x6x6xf32> to vector<2x6x6xf32>
    %23 = vector.extract_strided_slice %19 {offsets = [6, 0, 0], sizes = [2, 6, 6], strides = [1, 1, 1]} : vector<10x6x6xf32> to vector<2x6x6xf32>
    %24 = vector.extract_strided_slice %19 {offsets = [8, 0, 0], sizes = [2, 6, 6], strides = [1, 1, 1]} : vector<10x6x6xf32> to vector<2x6x6xf32>
    %25 = arith.mulf %20, %20 : vector<2x6x6xf32>
    %26 = arith.subf %22, %25 : vector<2x6x6xf32>
    %27 = arith.mulf %21, %21 : vector<2x6x6xf32>
    %28 = arith.subf %23, %27 : vector<2x6x6xf32>
    %29 = arith.mulf %20, %21 : vector<2x6x6xf32>
    %30 = arith.subf %24, %29 : vector<2x6x6xf32>
    %cst_17 = arith.constant 2.000000e+00 : f32
    %31 = vector.broadcast %cst_17 : f32 to vector<2x6x6xf32>
    %32 = arith.mulf %31, %30 : vector<2x6x6xf32>
    %cst_18 = arith.constant 8.99999984E-4 : f32
    %33 = vector.broadcast %cst_18 : f32 to vector<2x6x6xf32>
    %34 = arith.addf %32, %33 : vector<2x6x6xf32>
    %35 = arith.addf %26, %28 : vector<2x6x6xf32>
    %cst_19 = arith.constant 8.99999984E-4 : f32
    %36 = vector.broadcast %cst_19 : f32 to vector<2x6x6xf32>
    %37 = arith.addf %35, %36 : vector<2x6x6xf32>
    %38 = arith.divf %34, %37 : vector<2x6x6xf32>
    %cst_20 = arith.constant 2.000000e+00 : f32
    %39 = vector.broadcast %cst_20 : f32 to vector<2x6x6xf32>
    %40 = arith.mulf %39, %20 : vector<2x6x6xf32>
    %41 = arith.mulf %40, %21 : vector<2x6x6xf32>
    %cst_21 = arith.constant 9.99999974E-5 : f32
    %42 = vector.broadcast %cst_21 : f32 to vector<2x6x6xf32>
    %43 = arith.addf %41, %42 : vector<2x6x6xf32>
    %44 = arith.mulf %38, %43 : vector<2x6x6xf32>
    %45 = arith.mulf %20, %20 : vector<2x6x6xf32>
    %46 = arith.mulf %21, %21 : vector<2x6x6xf32>
    %47 = arith.addf %45, %46 : vector<2x6x6xf32>
    %cst_22 = arith.constant 9.99999974E-5 : f32
    %48 = vector.broadcast %cst_22 : f32 to vector<2x6x6xf32>
    %49 = arith.addf %47, %48 : vector<2x6x6xf32>
    %50 = arith.divf %44, %49 : vector<2x6x6xf32>
    %51 = vector.shape_cast %50 : vector<2x6x6xf32> to vector<1x2x6x6xf32>
    %cst_23 = arith.constant dense<0.000000e+00> : vector<1xf32>
    %52 = vector.multi_reduction <add>, %51, %cst_23 [1, 2, 3] : vector<1x2x6x6xf32> to vector<1xf32>
    %53 = vector.shape_cast %52 : vector<1xf32> to vector<1x1x1x1xf32>
    %54 = vector.extract %53[0, 0, 0, 0] : f32 from vector<1x1x1x1xf32>
    %c0_24 = arith.constant 0 : index
    %c0_25 = arith.constant 0 : index
    %55 = memref.load %arg5[%c0_24, %c0_25] : memref<1x1xf32, #tpu.memory_space<smem>>
    memref.store %54, %arg5[%c0_24, %c0_25] : memref<1x1xf32, #tpu.memory_space<smem>>
    return
  }
  func.func @transform_0(%arg0: i32) -> (i32, i32, i32, i32) {
    %c0_i32 = arith.constant 0 : i32
    %c0_i32_0 = arith.constant 0 : i32
    %c0_i32_1 = arith.constant 0 : i32
    %c0_i32_2 = arith.constant 0 : i32
    return %arg0, %c0_i32, %c0_i32_0, %c0_i32_1 : i32, i32, i32, i32
  }
  func.func @transform_1(%arg0: i32) -> (i32, i32, i32, i32) {
    %c0_i32 = arith.constant 0 : i32
    %c0_i32_0 = arith.constant 0 : i32
    %c0_i32_1 = arith.constant 0 : i32
    %c0_i32_2 = arith.constant 0 : i32
    return %arg0, %c0_i32, %c0_i32_0, %c0_i32_1 : i32, i32, i32, i32
  }
  func.func @transform_2(%arg0: i32) -> (i32, i32) {
    %c0_i32 = arith.constant 0 : i32
    %c0_i32_0 = arith.constant 0 : i32
    %c0_i32_1 = arith.constant 0 : i32
    return %c0_i32, %c0_i32_0 : i32, i32
  }
  func.func @transform_3(%arg0: i32) -> (i32, i32) {
    %c0_i32 = arith.constant 0 : i32
    %c0_i32_0 = arith.constant 0 : i32
    %c0_i32_1 = arith.constant 0 : i32
    return %c0_i32, %c0_i32_0 : i32, i32
  }
  func.func @transform_4(%arg0: i32) -> (i32, i32) {
    %c0_i32 = arith.constant 0 : i32
    %c0_i32_0 = arith.constant 0 : i32
    return %arg0, %c0_i32 : i32, i32
  }
}

</mosaic_0001>

<bundles_post_ra>
// kernel: tpu_custom_call.1
= control target key start
LH: loop header
LB: loop body
LE: loop exit
PB: predicated region body
PF: predicated region fallthrough
CT: control target
= control target key end

     0   :  { %9 = vsyncpa [#allocation3], 0  ;;  %s9017_s0 = inlined_call_operand.hbm [shape: f32[2,4,16,16], index: 0, kind: input, shape index: {}]   ;;  %s9018_s1 = inlined_call_operand.hbm [shape: f32[2,4,16,16], index: 1, kind: input, shape index: {}]   ;;  %s9019_s2 = inlined_call_operand.hbm [shape: f32[6,16], index: 2, kind: input, shape index: {}]   ;;  %s9020_s3 = inlined_call_operand.hbm [shape: f32[16,6], index: 3, kind: input, shape index: {}]   ;;  %s9021_s4 = inlined_call_operand.hbm [shape: f32[1,1], index: 4, kind: output, shape index: {}]  }
   0x1   :  { %10 = vsyncpa [#allocation6], 0 }
   0x2   :  { %11 = vsyncpa [#allocation9], 0 }
   0x3   :  { %12 = vsyncpa [#allocation4], 0  ;;  %s7761_s15 = smov [#allocation5]   ;;  %s7762_s17 = smov [#allocation2]  }
   0x4   :  { %s30_s16 = sshll.u32 %s7761_s15, 4  ;;  %s18_s18 = sshll.u32 %s7762_s17, 4  ;;  %s31_s16 = int_to_ptr.vmem [resolvable:$true] %s30_s16  ;;  %s7796_s18 = int_to_ptr.vmem [resolvable:$true] %s18_s18 }
   0x5   :  { %s7655_s21 = scalar_lea.hbm %s9018_s1, 2048 }
   0x6   :  { %p7656_p0 = scmp.ne.s32.totalorder %s9018_s1, %s7655_s21  ;;  %p7659_p1 = scmp.lt.u32.totalorder %s7655_s21, %s9018_s1 }
   0x8   :  { %p7661_p2 = pnand %p7659_p1, %p7656_p0 }
   0xa   :  { %7664 = shalt.err (!%p7661_p2)
}
   0xb   :  { %s7665_s26 = scalar_lea.vmem %s31_s16, 2048  ;;  %p7670_p4 = scmp.lt.s32.totalorder %s31_s16, %s31_s16 }
   0xc   :  { %p7666_p3 = scmp.ne.s32.totalorder %s31_s16, %s7665_s26  ;;  %p7671_p5 = scmp.lt.s32.totalorder %s7665_s26, %s7665_s26 }
   0xe   :  { %p7672_p6 = por %p7671_p5, %p7670_p4 }
  0x10   :  { %p7673_p7 = pnand %p7672_p6, %p7666_p3 }
  0x12   :  { %7676 = shalt.err (!%p7673_p7)
}
  0x13   :  { %s7763_s27 = smov 128   ;;  %s7764_s28 = smov 8  }
  0x14   :  { %36 = dma.hbm_to_vmem [thread:$0]  %s9018_s1, 2048, %s31_s16, [#allocation6], %s7763_s27, %s7763_s27, %s7764_s28  }
  0x15   :  { %s7677_s7 = scalar_lea.hbm %s9017_s0, 2048 }
  0x16   :  { %p7678_p8 = scmp.ne.s32.totalorder %s9017_s0, %s7677_s7  ;;  %p7681_p9 = scmp.lt.u32.totalorder %s7677_s7, %s9017_s0 }
  0x18   :  { %p7683_p10 = pnand %p7681_p9, %p7678_p8 }
  0x1a   :  { %7686 = shalt.err (!%p7683_p10)
}
  0x1b   :  { %s7687_s12 = scalar_lea.vmem %s7796_s18, 2048  ;;  %p7692_p12 = scmp.lt.s32.totalorder %s7796_s18, %s7796_s18 }
  0x1c   :  { %p7688_p11 = scmp.ne.s32.totalorder %s7796_s18, %s7687_s12  ;;  %p7693_p13 = scmp.lt.s32.totalorder %s7687_s12, %s7687_s12 }
  0x1e   :  { %p7694_p0 = por %p7693_p13, %p7692_p12 }
  0x20   :  { %p7695_p1 = pnand %p7694_p0, %p7688_p11 }
  0x22   :  { %7698 = shalt.err (!%p7695_p1)
}
  0x23   :  { %24 = dma.hbm_to_vmem [thread:$0]  %s9017_s0, 2048, %s7796_s18, [#allocation3], %s7763_s27, %s7763_s27, %s7764_s28  }
  0x24   :  { %s7765_s14 = smov [#allocation7]   ;;  %s7766_s16 = smov [#allocation8]  }
  0x25   :  { %s43_s15 = sshll.u32 %s7765_s14, 4  ;;  %s52_s17 = sshll.u32 %s7766_s16, 4  ;;  %s44_s15 = int_to_ptr.vmem [resolvable:$true] %s43_s15  ;;  %s7833_s17 = int_to_ptr.vmem [resolvable:$true] %s52_s17 }
  0x26   :  { %s7699_s21 = scalar_lea.hbm %s9019_s2, 128 }
  0x27   :  { %p7700_p2 = scmp.ne.s32.totalorder %s9019_s2, %s7699_s21  ;;  %p7703_p3 = scmp.lt.u32.totalorder %s7699_s21, %s9019_s2 }
  0x29   :  { %p7705_p4 = pnand %p7703_p3, %p7700_p2 }
  0x2b   :  { %7708 = shalt.err (!%p7705_p4)
}
  0x2c   :  { %s7709_s0 = scalar_lea.vmem %s44_s15, 128  ;;  %p7714_p6 = scmp.lt.s32.totalorder %s44_s15, %s44_s15 }
  0x2d   :  { %p7710_p5 = scmp.ne.s32.totalorder %s44_s15, %s7709_s0  ;;  %p7715_p7 = scmp.lt.s32.totalorder %s7709_s0, %s7709_s0 }
  0x2f   :  { %p7716_p8 = por %p7715_p7, %p7714_p6 }
  0x31   :  { %p7717_p9 = pnand %p7716_p8, %p7710_p5 }
  0x33   :  { %7720 = shalt.err (!%p7717_p9)
}
  0x34   :  { %46 = dma.hbm_to_vmem [thread:$0]  %s9019_s2, 128, %s44_s15, [#allocation6]  }
  0x35   :  { %s7721_s5 = scalar_lea.hbm %s9020_s3, 256 }
  0x36   :  { %p7722_p10 = scmp.ne.s32.totalorder %s9020_s3, %s7721_s5  ;;  %p7725_p11 = scmp.lt.u32.totalorder %s7721_s5, %s9020_s3 }
  0x38   :  { %p7727_p12 = pnand %p7725_p11, %p7722_p10 }
  0x3a   :  { %7730 = shalt.err (!%p7727_p12)
}
  0x3b   :  { %s7731_s10 = scalar_lea.vmem %s7833_s17, 256  ;;  %p7736_p0 = scmp.lt.s32.totalorder %s7833_s17, %s7833_s17 }
  0x3c   :  { %p7732_p13 = scmp.ne.s32.totalorder %s7833_s17, %s7731_s10  ;;  %p7737_p1 = scmp.lt.s32.totalorder %s7731_s10, %s7731_s10 }
  0x3e   :  { %p7738_p2 = por %p7737_p1, %p7736_p0 }
  0x40   :  { %p7739_p3 = pnand %p7738_p2, %p7732_p13 }
  0x42   :  { %7742 = shalt.err (!%p7739_p3)
}
  0x43   :  { %58 = dma.hbm_to_vmem [thread:$0]  %s9020_s3, 256, %s7833_s17, [#allocation9], %s7763_s27, %s7763_s27, %s7764_s28  }
  0x44   :  { %7753 = dma.done.wait [#allocation3], 2048  }
  0x45   :  { %7754 = vsyncadd [#allocation3], 4294965248 }
  0x46   :  { %7755 = dma.done.wait [#allocation6], 2176  }
  0x47   :  { %7756 = vsyncadd [#allocation6], 4294965120 }
  0x48   :  { %7757 = dma.done.wait [#allocation9], 256  }
  0x49   :  { %7758 = vsyncadd [#allocation9], 4294967040  ;;  %vm106_vm0 = vcmask 130048   ;;  %v104_v0 = vld [vmem:[#allocation8] sm:$0xff]  ;;  %v105_v1 = vld [vmem:[#allocation8 + $0x8] sm:$0xff]  ;;  %vm7768_vm1 = vmmov 0  }
  0x4a   :  { %v71_v2 = vld [vmem:[#allocation2] sm:$0xff]  ;;  %v356_v3 = vand.u32 4294901760, %v104_v0  ;;  %v359_v4 = vand.u32 4294901760, %v105_v1  ;;  %v73_v5 = vld [vmem:[#allocation2 + $0x10] sm:$0xff]  ;;  %v7889_v22 = vld [vmem:[#allocation2 + $0x8] sm:$0xff]  ;;  %vm6264_vm2 = vcmask 46080  }
  0x4b   :  { %v75_v6 = vld [vmem:[#allocation2 + $0x20] sm:$0xff]  ;;  %v77_v7 = vld [vmem:[#allocation2 + $0x30] sm:$0xff]  ;;  %v107_v8 = vsel %vm106_vm0, %v71_v2, 0.0  ;;  %v7868_v9 = vmul.f32 %v71_v2, %v71_v2  ;;  %v108_v13 = vsel %vm106_vm0, %v73_v5, 0.0  ;;  %v7879_v16 = vmul.f32 %v73_v5, %v73_v5  ;;  %v7891_v23 = vld [vmem:[#allocation2 + $0x18] sm:$0xff]  ;;  %s7743_s12 = scalar_lea.hbm %s9021_s4, 16 }
  0x4c   :  { %v7870_v10 = vld [vmem:[#allocation5] sm:$0xff]  ;;  %v7872_v11 = vld [vmem:[#allocation5 + $0x10] sm:$0xff]  ;;  %v110_v14 = vsel %vm106_vm0, %v75_v6, 0.0  ;;  %v112_v15 = vsel %vm106_vm0, %v77_v7, 0.0  ;;  %v7881_v17 = vpack.c.bf16 %v359_v4, %v356_v3  ;;  %v109_v19 = vadd.f32 %v108_v13, %v107_v8  ;;  %v7905_v28 = vld [vmem:[#allocation2 + $0x28] sm:$0xff]  ;;  %p7744_p4 = scmp.ne.s32.totalorder %s9021_s4, %s7743_s12  ;;  %p7747_p5 = scmp.lt.u32.totalorder %s7743_s12, %s9021_s4 }
  0x4d   :  { %v7874_v12 = vld [vmem:[#allocation5 + $0x20] sm:$0xff]  ;;  %v7883_v18 = vld [vmem:[#allocation5 + $0x30] sm:$0xff]  ;;  %v7885_v20 = vmul.f32 %v75_v6, %v75_v6  ;;  %v7887_v21 = vmul.f32 %v77_v7, %v77_v7  ;;  %v7894_v24 = vmul.f32 %v7870_v10, %v71_v2  ;;  %v7897_v25 = vmul.f32 %v7872_v11, %v73_v5  ;;  %v7907_v29 = vld [vmem:[#allocation2 + $0x38] sm:$0xff] }
  0x4e   :  { %v7900_v26 = vmul.f32 %v7874_v12, %v75_v6  ;;  %v7903_v27 = vmul.f32 %v7883_v18, %v77_v7  ;;  %v7909_v30 = vld [vmem:[#allocation2 + $0x40] sm:$0xff]  ;;  %7232 = vmatprep.subr.bf16.mxu0 %v7881_v17  ;;  %v111_v31 = vadd.f32 %v110_v14, %v109_v19  ;;  %v114_v32 = vsel %vm106_vm0, %v7889_v22, 0.0  ;;  %v7918_v35 = vld [vmem:[#allocation2 + $0x50] sm:$0xff]  ;;  %v7931_v42 = vld [vmem:[#allocation2 + $0x48] sm:$0xff]  ;;  %p7749_p6 = pnand %p7747_p5, %p7744_p4 }
  0x4f   :  { %v115_v33 = vsel %vm106_vm0, %v7891_v23, 0.0  ;;  %v117_v34 = vsel %vm106_vm0, %v7905_v28, 0.0  ;;  %v7920_v36 = vld [vmem:[#allocation2 + $0x60] sm:$0xff]  ;;  %v7922_v37 = vld [vmem:[#allocation2 + $0x70] sm:$0xff]  ;;  %7234 = vmatpush3.bf16.msra.mxu0 %v7881_v17  ;;  %v119_v39 = vsel %vm106_vm0, %v7907_v29, 0.0  ;;  %v121_v40 = vsel %vm106_vm0, %v7909_v30, 0.0 }
  0x50   :  { %v116_v38 = vadd.f32 %v115_v33, %v114_v32  ;;  %v122_v41 = vsel %vm106_vm0, %v7918_v35, 0.0  ;;  %v7933_v43 = vld [vmem:[#allocation2 + $0x58] sm:$0xff]  ;;  %v7935_v44 = vld [vmem:[#allocation2 + $0x68] sm:$0xff]  ;;  %v113_v45 = vadd.f32 %v112_v15, %v111_v31  ;;  %v124_v47 = vsel %vm106_vm0, %v7920_v36, 0.0 }
  0x51   :  { %v123_v46 = vadd.f32 %v122_v41, %v121_v40  ;;  %v126_v48 = vsel %vm106_vm0, %v7922_v37, 0.0  ;;  %v7941_v49 = vld [vmem:[#allocation2 + $0x78] sm:$0xff]  ;;  %v128_v51 = vsel %vm106_vm0, %v7931_v42, 0.0  ;;  %v129_v52 = vsel %vm106_vm0, %v7933_v43, 0.0  ;;  %v7980_v32 = vld [vmem:[#allocation5 + $0x8] sm:$0xff] }
  0x52   :  { %v118_v50 = vadd.f32 %v117_v34, %v116_v38  ;;  %v131_v53 = vsel %vm106_vm0, %v7935_v44, 0.0  ;;  %v296_v54 = vsel %vm106_vm0, %v113_v45, 0  ;;  %v130_v56 = vadd.f32 %v129_v52, %v128_v51  ;;  %v7990_v40 = vld [vmem:[#allocation5 + $0x18] sm:$0xff]  ;;  %v8001_v52 = vld [vmem:[#allocation5 + $0x28] sm:$0xff] }
  0x53   :  { %v125_v55 = vadd.f32 %v124_v47, %v123_v46  ;;  %v133_v57 = vsel %vm106_vm0, %v7941_v49, 0.0  ;;  %v7952_v58 = vand.u32 4294901760, %v296_v54  ;;  %v7954_v60 = vsub.f32 %v104_v0, %v356_v3 }
  0x54   :  { %v120_v59 = vadd.f32 %v119_v39, %v118_v50  ;;  %v7956_v61 = vsub.f32 %v105_v1, %v359_v4  ;;  %v132_v63 = vadd.f32 %v131_v53, %v130_v56  ;;  %v135_v2 = vsel %vm106_vm0, %v7870_v10, 0.0  ;;  %v8003_v53 = vld [vmem:[#allocation5 + $0x38] sm:$0xff] }
  0x55   :  { %v127_v62 = vadd.f32 %v126_v48, %v125_v55  ;;  %v136_v5 = vsel %vm106_vm0, %v7872_v11, 0.0  ;;  %v7963_v6 = vsub.f32 %v296_v54, %v7952_v58  ;;  %v9027_v8 = vand.u32 4294901760, %v7954_v60 }
  0x56   :  { %v299_v7 = vsel %vm106_vm0, %v120_v59, 0  ;;  %v9026_v0 = vand.u32 4294901760, %v7956_v61  ;;  %v134_v4 = vadd.f32 %v133_v57, %v132_v63  ;;  %v137_v13 = vadd.f32 %v136_v5, %v135_v2 }
  0x57   :  { %9063 = vst [vmem:[#allocation15_spill] sm:$0xff] %v7963_v6  ;;  %v7968_v3 = vand.u32 4294901760, %v299_v7  ;;  %v302_v1 = vsel %vm106_vm0, %v127_v62, 0  ;;  %v9024_v14 = vand.u32 4294901760, %v7963_v6  ;;  %v626_v19 = vsub.f32 %v7954_v60, %v9027_v8  ;;  %v8013_v62 = vld [vmem:[#allocation5 + $0x40] sm:$0xff] }
  0x58   :  { %v7972_v15 = vand.u32 4294901760, %v302_v1  ;;  %v633_v31 = vsub.f32 %v7956_v61, %v9026_v0  ;;  %v305_v34 = vsel %vm106_vm0, %v134_v4, 0  ;;  %v138_v38 = vsel %vm106_vm0, %v7874_v12, 0.0 }
  0x59   :  { %v7983_v33 = vsub.f32 %v299_v7, %v7968_v3  ;;  %v140_v39 = vsel %vm106_vm0, %v7883_v18, 0.0  ;;  %v425_v41 = vsub.f32 %v7963_v6, %v9024_v14  ;;  %v7998_v46 = vand.u32 4294901760, %v305_v34  ;;  %v8052_v14 = vld [vmem:[#allocation5 + $0x78] sm:$0xff] }
  0x5a   :  { %v7996_v45 = vsub.f32 %v302_v1, %v7972_v15  ;;  %v627_v47 = vand.u32 4294901760, %v626_v19  ;;  %v634_v50 = vand.u32 4294901760, %v633_v31  ;;  %v139_v51 = vadd.f32 %v138_v38, %v137_v13  ;;  %v8018_v1 = vld [vmem:[#allocation5 + $0x50] sm:$0xff] }
  0x5b   :  { %9064 = vst [vmem:[#allocation16_spill] sm:$0xff] %v7983_v33  ;;  %v9023_v48 = vand.u32 4294901760, %v7983_v33  ;;  %v142_v54 = vsel %vm106_vm0, %v7980_v32, 0.0  ;;  %v426_v55 = vand.u32 4294901760, %v425_v41  ;;  %v8009_v57 = vsub.f32 %v305_v34, %v7998_v46  ;;  %v8028_v34 = vld [vmem:[#allocation5 + $0x60] sm:$0xff]  ;;  %v8030_v38 = vld [vmem:[#allocation5 + $0x70] sm:$0xff] }
  0x5c   :  { %9065 = vst [vmem:[#allocation17_spill] sm:$0xff] %v7996_v45  ;;  %v9022_v56 = vand.u32 4294901760, %v7996_v45  ;;  %v143_v59 = vsel %vm106_vm0, %v7990_v40, 0.0  ;;  %v7235_v2 = vpack.c.bf16 %v634_v50, %v627_v47  ;;  %v141_v5 = vadd.f32 %v140_v39, %v139_v51  ;;  %v8035_v51 = vld [vmem:[#allocation5 + $0x48] sm:$0xff] }
  0x5d   :  { %9066 = vst [vmem:[#allocation18_spill] sm:$0xff] %v8009_v57  ;;  %v435_v63 = vsub.f32 %v7983_v33, %v9023_v48  ;;  %v144_v7 = vadd.f32 %v143_v59, %v142_v54  ;;  %6611 = vmatprep.mubr.f32.mxu0 %v426_v55  ;;  %v9025_v13 = vand.u32 4294901760, %v8009_v57  ;;  %v145_v19 = vsel %vm106_vm0, %v8001_v52, 0.0  ;;  %v8037_v54 = vld [vmem:[#allocation5 + $0x58] sm:$0xff]  ;;  %v8046_v48 = vld [vmem:[#allocation5 + $0x68] sm:$0xff] }
  0x5e   :  { %v445_v4 = vsub.f32 %v7996_v45, %v9022_v56  ;;  %v147_v31 = vsel %vm106_vm0, %v8003_v53, 0.0  ;;  %7236 = vmatprep.subr.bf16.mxu0 %v7235_v2  ;;  %v308_v41 = vsel %vm106_vm0, %v141_v5, 0  ;;  %v149_v50 = vsel %vm106_vm0, %v8013_v62, 0.0 }
  0x5f   :  { %v436_v39 = vand.u32 4294901760, %v435_v63  ;;  %v146_v47 = vadd.f32 %v145_v19, %v144_v7  ;;  %v455_v59 = vsub.f32 %v8009_v57, %v9025_v13  ;;  %v8042_v56 = vand.u32 4294901760, %v308_v41 }
  0x60   :  { %v446_v55 = vand.u32 4294901760, %v445_v4  ;;  %v150_v63 = vsel %vm106_vm0, %v8018_v1, 0.0  ;;  %v152_v19 = vsel %vm106_vm0, %v8028_v34, 0.0  ;;  %v154_v4 = vsel %vm106_vm0, %v8030_v38, 0.0 }
  0x61   :  { %6612 = vmatmul.mubr.f32.vlgmr.msra.gmra.mrb[0].mxu0 %v436_v39  ;;  %v148_v5 = vadd.f32 %v147_v31, %v146_v47  ;;  %v151_v7 = vadd.f32 %v150_v63, %v149_v50  ;;  %v456_v13 = vand.u32 4294901760, %v455_v59  ;;  %v8055_v0 = vsub.f32 %v308_v41, %v8042_v56 }
  0x62   :  { %6614 = vmatprep.mubr.f32.mxu0 %v446_v55  ;;  %7238 = vmatpush3.bf16.msra.mxu0 %v7235_v2  ;;  %v156_v8 = vsel %vm106_vm0, %v8035_v51, 0.0  ;;  %v157_v31 = vsel %vm106_vm0, %v8037_v54, 0.0  ;;  %v159_v63 = vsel %vm106_vm0, %v8046_v48, 0.0  ;;  %v161_v2 = vsel %vm106_vm0, %v8052_v14, 0.0 }
  0x63   :  { %9067 = vst [vmem:[#allocation19_spill] sm:$0xff] %v8055_v0  ;;  %v311_v39 = vsel %vm106_vm0, %v148_v5, 0  ;;  %v153_v47 = vadd.f32 %v152_v19, %v151_v7  ;;  %v158_v50 = vadd.f32 %v157_v31, %v156_v8  ;;  %v9032_v55 = vand.u32 4294901760, %v8055_v0 }
  0x64   :  { %v8065_v59 = vand.u32 4294901760, %v311_v39  ;;  %v179_v41 = vsel %vm106_vm0, %v7868_v9, 0.0  ;;  %v180_v5 = vsel %vm106_vm0, %v7879_v16, 0.0  ;;  %v182_v8 = vsel %vm106_vm0, %v7885_v20, 0.0 }
  0x65   :  { %6615 = vmatmul.mubr.f32.gmra.mrb[2].mxu0 %v456_v13  ;;  %v155_v57 = vadd.f32 %v154_v4, %v153_v47  ;;  %v160_v45 = vadd.f32 %v159_v63, %v158_v50  ;;  %v465_v7 = vsub.f32 %v8055_v0, %v9032_v55  ;;  %v181_v31 = vadd.f32 %v180_v5, %v179_v41 }
  0x66   :  { %v8079_v19 = vsub.f32 %v311_v39, %v8065_v59  ;;  %v184_v9 = vsel %vm106_vm0, %v7887_v21, 0.0  ;;  %v164_v16 = vmul.f32 %v7889_v22, %v7889_v22  ;;  %v166_v20 = vmul.f32 %v7891_v23, %v7891_v23 }
  0x67   :  { %v314_v13 = vsel %vm106_vm0, %v155_v57, 0  ;;  %v162_v4 = vadd.f32 %v161_v2, %v160_v45  ;;  %v466_v47 = vand.u32 4294901760, %v465_v7  ;;  %v183_v39 = vadd.f32 %v182_v8, %v181_v31 }
  0x68   :  { %9068 = vst [vmem:[#allocation20_spill] sm:$0xff] %v8079_v19  ;;  %v9035_v50 = vand.u32 4294901760, %v8079_v19  ;;  %v8089_v63 = vand.u32 4294901760, %v314_v13  ;;  %v168_v21 = vmul.f32 %v7905_v28, %v7905_v28  ;;  %v170_v45 = vmul.f32 %v7907_v29, %v7907_v29 }
  0x69   :  { %v317_v41 = vsel %vm106_vm0, %v162_v4, 0  ;;  %v186_v57 = vsel %vm106_vm0, %v164_v16, 0.0  ;;  %6617 = vmatprep.mubr.f32.mxu0 %v466_v47  ;;  %v185_v8 = vadd.f32 %v184_v9, %v183_v39  ;;  %v187_v31 = vsel %vm106_vm0, %v166_v20, 0.0 }
  0x6a   :  { %9069 = vst [vmem:[#allocation21_spill] sm:$0xff] %v8089_v63  ;;  %v475_v2 = vsub.f32 %v8079_v19, %v9035_v50  ;;  %v8101_v5 = vsub.f32 %v314_v13, %v8089_v63  ;;  %v8103_v7 = vand.u32 4294901760, %v317_v41  ;;  %v189_v4 = vsel %vm106_vm0, %v168_v21, 0.0 }
  0x6b   :  { %v191_v55 = vsel %vm106_vm0, %v170_v45, 0.0  ;;  %v171_v16 = vmul.f32 %v7909_v30, %v7909_v30  ;;  %v320_v13 = vsel %vm106_vm0, %v185_v8, 0  ;;  %v188_v9 = vadd.f32 %v187_v31, %v186_v57 }
  0x6c   :  { %9070 = vst [vmem:[#allocation22_spill] sm:$0xff] %v8101_v5  ;;  %9071 = vst [vmem:[#allocation23_spill] sm:$0xff] %v8103_v7  ;;  %v476_v47 = vand.u32 4294901760, %v475_v2  ;;  %v9040_v0 = vand.u32 4294901760, %v8101_v5  ;;  %v8112_v50 = vsub.f32 %v317_v41, %v8103_v7  ;;  %v8115_v19 = vand.u32 4294901760, %v320_v13 }
  0x6d   :  { %v173_v20 = vmul.f32 %v7918_v35, %v7918_v35  ;;  %v175_v39 = vmul.f32 %v7920_v36, %v7920_v36  ;;  %v177_v41 = vmul.f32 %v7922_v37, %v7922_v37  ;;  %v193_v2 = vsel %vm106_vm0, %v171_v16, 0.0 }
  0x6e   :  { %6618 = vmatmul.mubr.f32.gmra.mrb[4].mxu0 %v476_v47  ;;  %v485_v21 = vsub.f32 %v8101_v5, %v9040_v0  ;;  %v9049_v45 = vand.u32 4294901760, %v8112_v50  ;;  %v8129_v57 = vsub.f32 %v320_v13, %v8115_v19  ;;  %v190_v8 = vadd.f32 %v189_v4, %v188_v9 }
  0x6f   :  { %v194_v31 = vsel %vm106_vm0, %v173_v20, 0.0  ;;  %v196_v33 = vsel %vm106_vm0, %v175_v39, 0.0  ;;  %v198_v6 = vsel %vm106_vm0, %v177_v41, 0.0  ;;  %v172_v16 = vmul.f32 %v7931_v42, %v7931_v42 }
  0x70   :  { %9072 = vst [vmem:[#allocation24_spill] sm:$0xff] %v8129_v57  ;;  %v486_v47 = vand.u32 4294901760, %v485_v21  ;;  %v495_v0 = vsub.f32 %v8112_v50, %v9049_v45  ;;  %v195_v5 = vadd.f32 %v194_v31, %v193_v2  ;;  %v9051_v7 = vand.u32 4294901760, %v8129_v57 }
  0x71   :  { %v192_v63 = vadd.f32 %v191_v55, %v190_v8  ;;  %v174_v4 = vmul.f32 %v7933_v43, %v7933_v43  ;;  %v176_v20 = vmul.f32 %v7935_v44, %v7935_v44  ;;  %v178_v39 = vmul.f32 %v7941_v49, %v7941_v49 }
  0x72   :  { %6620 = vmatprep.mubr.f32.mxu0 %v486_v47  ;;  %v496_v13 = vand.u32 4294901760, %v495_v0  ;;  %v197_v9 = vadd.f32 %v196_v33, %v195_v5  ;;  %v505_v21 = vsub.f32 %v8129_v57, %v9051_v7  ;;  %v200_v41 = vsel %vm106_vm0, %v172_v16, 0.0 }
  0x73   :  { %v323_v55 = vsel %vm106_vm0, %v192_v63, 0  ;;  %v201_v2 = vsel %vm106_vm0, %v174_v4, 0.0  ;;  %v203_v5 = vsel %vm106_vm0, %v176_v20, 0.0  ;;  %v205_v47 = vsel %vm106_vm0, %v178_v39, 0.0 }
  0x74   :  { %6621 = vmatmul.mubr.f32.gmra.mrb[6].mxu0 %v496_v13  ;;  %v8152_v8 = vand.u32 4294901760, %v323_v55  ;;  %v199_v0 = vadd.f32 %v198_v6, %v197_v9  ;;  %v202_v33 = vadd.f32 %v201_v2, %v200_v41  ;;  %v506_v31 = vand.u32 4294901760, %v505_v21 }
  0x75   :  { %v207_v45 = vmul.f32 %v7870_v10, %v7870_v10  ;;  %v209_v63 = vmul.f32 %v7872_v11, %v7872_v11  ;;  %v211_v6 = vmul.f32 %v7874_v12, %v7874_v12  ;;  %v213_v20 = vmul.f32 %v7883_v18, %v7883_v18 }
  0x76   :  { %v8161_v16 = vsub.f32 %v323_v55, %v8152_v8  ;;  %v326_v4 = vsel %vm106_vm0, %v199_v0, 0  ;;  %v204_v13 = vadd.f32 %v203_v5, %v202_v33  ;;  %6623 = vmatprep.mubr.f32.mxu0 %v506_v31  ;;  %v208_v0 = vmul.f32 %v7980_v32, %v7980_v32 }
  0x77   :  { %v8166_v9 = vand.u32 4294901760, %v326_v4  ;;  %v223_v10 = vsel %vm106_vm0, %v207_v45, 0.0  ;;  %v224_v39 = vsel %vm106_vm0, %v209_v63, 0.0  ;;  %v226_v41 = vsel %vm106_vm0, %v211_v6, 0.0 }
  0x78   :  { %9073 = vst [vmem:[#allocation25_spill] sm:$0xff] %v8161_v16  ;;  %v9050_v11 = vand.u32 4294901760, %v8161_v16  ;;  %v206_v21 = vadd.f32 %v205_v47, %v204_v13  ;;  %v225_v55 = vadd.f32 %v224_v39, %v223_v10  ;;  %v228_v12 = vsel %vm106_vm0, %v213_v20, 0.0 }
  0x79   :  { %v8175_v2 = vsub.f32 %v326_v4, %v8166_v9  ;;  %v210_v18 = vmul.f32 %v7990_v40, %v7990_v40  ;;  %v212_v31 = vmul.f32 %v8001_v52, %v8001_v52  ;;  %v214_v4 = vmul.f32 %v8003_v53, %v8003_v53 }
  0x7a   :  { %v515_v45 = vsub.f32 %v8161_v16, %v9050_v11  ;;  %v329_v33 = vsel %vm106_vm0, %v206_v21, 0  ;;  %v227_v5 = vadd.f32 %v226_v41, %v225_v55  ;;  %v230_v13 = vsel %vm106_vm0, %v208_v0, 0.0 }
  0x7b   :  { %9074 = vst [vmem:[#allocation26_spill] sm:$0xff] %v8175_v2  ;;  %v9052_v47 = vand.u32 4294901760, %v8175_v2  ;;  %v8189_v63 = vand.u32 4294901760, %v329_v33  ;;  %v231_v10 = vsel %vm106_vm0, %v210_v18, 0.0  ;;  %v233_v39 = vsel %vm106_vm0, %v212_v31, 0.0 }
  0x7c   :  { %v516_v6 = vand.u32 4294901760, %v515_v45  ;;  %v229_v20 = vadd.f32 %v228_v12, %v227_v5  ;;  %v232_v41 = vadd.f32 %v231_v10, %v230_v13  ;;  %v235_v11 = vsel %vm106_vm0, %v214_v4, 0.0 }
  0x7d   :  { %v525_v21 = vsub.f32 %v8175_v2, %v9052_v47  ;;  %v8200_v55 = vsub.f32 %v329_v33, %v8189_v63  ;;  %v215_v12 = vmul.f32 %v8013_v62, %v8013_v62  ;;  %v217_v0 = vmul.f32 %v8018_v1, %v8018_v1 }
  0x7e   :  { %6624 = vmatmul.mubr.f32.gmra.mrb[8].mxu0 %v516_v6  ;;  %v332_v7 = vsel %vm106_vm0, %v229_v20, 0  ;;  %v219_v18 = vmul.f32 %v8028_v34, %v8028_v34  ;;  %v234_v31 = vadd.f32 %v233_v39, %v232_v41  ;;  %v221_v4 = vmul.f32 %v8030_v38, %v8030_v38 }
  0x7f   :  { %9075 = vst [vmem:[#allocation27_spill] sm:$0xff] %v8200_v55  ;;  %v526_v45 = vand.u32 4294901760, %v525_v21  ;;  %v9055_v5 = vand.u32 4294901760, %v8200_v55  ;;  %v8211_v33 = vand.u32 4294901760, %v332_v7  ;;  %v237_v13 = vsel %vm106_vm0, %v215_v12, 0.0 }
  0x80   :  { %v238_v6 = vsel %vm106_vm0, %v217_v0, 0.0  ;;  %v240_v20 = vsel %vm106_vm0, %v219_v18, 0.0  ;;  %v236_v47 = vadd.f32 %v235_v11, %v234_v31  ;;  %v242_v39 = vsel %vm106_vm0, %v221_v4, 0.0 }
  0x81   :  { %6626 = vmatprep.mubr.f32.mxu0 %v526_v45  ;;  %v535_v10 = vsub.f32 %v8200_v55, %v9055_v5  ;;  %v8222_v21 = vsub.f32 %v332_v7, %v8211_v33  ;;  %v239_v2 = vadd.f32 %v238_v6, %v237_v13  ;;  %v216_v41 = vmul.f32 %v8035_v51, %v8035_v51 }
  0x82   :  { %v218_v12 = vmul.f32 %v8037_v54, %v8037_v54  ;;  %v220_v0 = vmul.f32 %v8046_v48, %v8046_v48  ;;  %v335_v5 = vsel %vm106_vm0, %v236_v47, 0  ;;  %v222_v11 = vmul.f32 %v8052_v14, %v8052_v14 }
  0x83   :  { %v536_v18 = vand.u32 4294901760, %v535_v10  ;;  %v9062_v45 = vand.u32 4294901760, %v8222_v21  ;;  %v241_v7 = vadd.f32 %v240_v20, %v239_v2  ;;  %v8233_v55 = vand.u32 4294901760, %v335_v5 }
  0x84   :  { %v244_v31 = vsel %vm106_vm0, %v216_v41, 0.0  ;;  %v245_v4 = vsel %vm106_vm0, %v218_v12, 0.0  ;;  %v247_v16 = vsel %vm106_vm0, %v220_v0, 0.0  ;;  %v249_v47 = vsel %vm106_vm0, %v222_v11, 0.0 }
  0x85   :  { %6627 = vmatmul.mubr.f32.gmra.mrb[10].mxu0 %v536_v18  ;;  %v545_v13 = vsub.f32 %v8222_v21, %v9062_v45  ;;  %v243_v6 = vadd.f32 %v242_v39, %v241_v7  ;;  %v246_v10 = vadd.f32 %v245_v4, %v244_v31  ;;  %v8244_v2 = vsub.f32 %v335_v5, %v8233_v55 }
  0x86   :  { %v267_v20 = vsel %vm106_vm0, %v7894_v24, 0.0  ;;  %v268_v41 = vsel %vm106_vm0, %v7897_v25, 0.0  ;;  %v270_v5 = vsel %vm106_vm0, %v7900_v26, 0.0  ;;  %v272_v0 = vsel %vm106_vm0, %v7903_v27, 0.0 }
  0x87   :  { %v546_v12 = vand.u32 4294901760, %v545_v13  ;;  %v338_v18 = vsel %vm106_vm0, %v243_v6, 0  ;;  %v248_v57 = vadd.f32 %v247_v16, %v246_v10  ;;  %v269_v45 = vadd.f32 %v268_v41, %v267_v20 }
  0x88   :  { %v554_v39 = vand.u32 4294901760, %v8244_v2  ;;  %v8253_v7 = vand.u32 4294901760, %v338_v18  ;;  %v252_v25 = vmul.f32 %v7980_v32, %v7889_v22  ;;  %v254_v16 = vmul.f32 %v7990_v40, %v7891_v23 }
  0x89   :  { %6629 = vmatprep.mubr.f32.mxu0 %v546_v12  ;;  %v250_v24 = vadd.f32 %v249_v47, %v248_v57  ;;  %v271_v11 = vadd.f32 %v270_v5, %v269_v45  ;;  %v256_v26 = vmul.f32 %v8001_v52, %v7905_v28  ;;  %v258_v27 = vmul.f32 %v8003_v53, %v7907_v29 }
  0x8a   :  { %v555_v31 = vsub.f32 %v8244_v2, %v554_v39  ;;  %v8267_v4 = vsub.f32 %v338_v18, %v8253_v7  ;;  %v274_v22 = vsel %vm106_vm0, %v252_v25, 0.0  ;;  %v275_v23 = vsel %vm106_vm0, %v254_v16, 0.0 }
  0x8b   :  { %v341_v57 = vsel %vm106_vm0, %v250_v24, 0  ;;  %v273_v45 = vadd.f32 %v272_v0, %v271_v11  ;;  %v276_v6 = vadd.f32 %v275_v23, %v274_v22  ;;  %v277_v28 = vsel %vm106_vm0, %v256_v26, 0.0 }
  0x8c   :  { %v556_v32 = vand.u32 4294901760, %v555_v31  ;;  %v564_v40 = vand.u32 4294901760, %v8267_v4  ;;  %v8277_v13 = vand.u32 4294901760, %v341_v57  ;;  %v279_v52 = vsel %vm106_vm0, %v258_v27, 0.0 }
  0x8d   :  { %v344_v10 = vsel %vm106_vm0, %v273_v45, 0  ;;  %v259_v29 = vmul.f32 %v8013_v62, %v7909_v30  ;;  %v278_v41 = vadd.f32 %v277_v28, %v276_v6  ;;  %v261_v12 = vmul.f32 %v8018_v1, %v7918_v35 }
  0x8e   :  { %6630 = vmatmul.mubr.f32.gmra.mrb[12].mxu0 %v556_v32  ;;  %v565_v53 = vsub.f32 %v8267_v4, %v564_v40  ;;  %v8288_v47 = vsub.f32 %v341_v57, %v8277_v13  ;;  %v8290_v20 = vand.u32 4294901760, %v344_v10  ;;  %v263_v18 = vmul.f32 %v8028_v34, %v7920_v36 }
  0x8f   :  { %v265_v30 = vmul.f32 %v8030_v38, %v7922_v37  ;;  %v281_v62 = vsel %vm106_vm0, %v259_v29, 0.0  ;;  %v280_v11 = vadd.f32 %v279_v52, %v278_v41  ;;  %v282_v25 = vsel %vm106_vm0, %v261_v12, 0.0 }
  0x90   :  { %v566_v5 = vand.u32 4294901760, %v565_v53  ;;  %v574_v0 = vand.u32 4294901760, %v8288_v47  ;;  %v8301_v24 = vsub.f32 %v344_v10, %v8290_v20  ;;  %v284_v16 = vsel %vm106_vm0, %v263_v18, 0.0 }
  0x91   :  { %v286_v35 = vsel %vm106_vm0, %v265_v30, 0.0  ;;  %v260_v36 = vmul.f32 %v8035_v51, %v7931_v42  ;;  %v347_v34 = vsel %vm106_vm0, %v280_v11, 0  ;;  %v283_v38 = vadd.f32 %v282_v25, %v281_v62 }
  0x92   :  { %6632 = vmatprep.mubr.f32.mxu0 %v566_v5  ;;  %v575_v37 = vsub.f32 %v8288_v47, %v574_v0  ;;  %v584_v1 = vand.u32 4294901760, %v8301_v24  ;;  %v8313_v31 = vand.u32 4294901760, %v347_v34  ;;  %v262_v26 = vmul.f32 %v8037_v54, %v7933_v43 }
  0x93   :  { %v264_v27 = vmul.f32 %v8046_v48, %v7935_v44  ;;  %v266_v42 = vmul.f32 %v8052_v14, %v7941_v49  ;;  %v285_v45 = vadd.f32 %v284_v16, %v283_v38  ;;  %v288_v22 = vsel %vm106_vm0, %v260_v36, 0.0  ;;  %v9079_v38 = vld [vmem:[#allocation23_spill] sm:$0xff] }
  0x94   :  { %v576_v51 = vand.u32 4294901760, %v575_v37  ;;  %v585_v57 = vsub.f32 %v8301_v24, %v584_v1  ;;  %v8326_v23 = vsub.f32 %v347_v34, %v8313_v31  ;;  %v289_v32 = vsel %vm106_vm0, %v262_v26, 0.0  ;;  %v9078_v34 = vld [vmem:[#allocation21_spill] sm:$0xff]  ;;  %v9080_v26 = vld [vmem:[#allocation15_spill] sm:$0xff] }
  0x95   :  { %v291_v43 = vsel %vm106_vm0, %v264_v27, 0.0  ;;  %v287_v48 = vadd.f32 %v286_v35, %v285_v45  ;;  %v290_v54 = vadd.f32 %v289_v32, %v288_v22  ;;  %v7239_v49 = vpack.c.bf16 %v7956_v61, %v7954_v60  ;;  %v9081_v27 = vld [vmem:[#allocation16_spill] sm:$0xff]  ;;  %v9086_v22 = vld [vmem:[#allocation22_spill] sm:$0xff] }
  0x96   :  { %6633 = vmatmul.mubr.f32.gmra.mrb[14].mxu0 %v576_v51  ;;  %v586_v44 = vand.u32 4294901760, %v585_v57  ;;  %v594_v14 = vand.u32 4294901760, %v8326_v23  ;;  %v293_v6 = vsel %vm106_vm0, %v266_v42, 0.0  ;;  %v9076_v10 = vand.u32 4294901760, %v7954_v60  ;;  %v9082_v42 = vld [vmem:[#allocation17_spill] sm:$0xff]  ;;  %v9083_v51 = vld [vmem:[#allocation18_spill] sm:$0xff] }
  0x97   :  { %v9077_v28 = vand.u32 4294901760, %v7956_v61  ;;  %v350_v29 = vsel %vm106_vm0, %v287_v48, 0  ;;  %v292_v53 = vadd.f32 %v291_v43, %v290_v54  ;;  %7240 = vmatprep.subr.bf16.mxu0 %v7239_v49  ;;  %v9084_v57 = vld [vmem:[#allocation19_spill] sm:$0xff]  ;;  %v9085_v45 = vld [vmem:[#allocation20_spill] sm:$0xff]  ;;  %v9088_v43 = vld [vmem:[#allocation25_spill] sm:$0xff]  ;;  %v9091_v54 = vand.u32 4294901760, %v9080_v26 }
  0x98   :  { %6635 = vmatprep.mubr.f32.mxu0 %v586_v44  ;;  %v595_v41 = vsub.f32 %v8326_v23, %v594_v14  ;;  %v8344_v12 = vand.u32 4294901760, %v350_v29  ;;  %v9087_v32 = vld [vmem:[#allocation24_spill] sm:$0xff]  ;;  %v9089_v44 = vld [vmem:[#allocation26_spill] sm:$0xff]  ;;  %v9090_v48 = vld [vmem:[#allocation27_spill] sm:$0xff] }
  0x99   :  { %v8338_v52 = vpack.c.bf16 %v9077_v28, %v9076_v10  ;;  %v294_v18 = vadd.f32 %v293_v6, %v292_v53  ;;  %v9093_v6 = vand.u32 4294901760, %v9082_v42  ;;  %v9094_v10 = vand.u32 4294901760, %v9083_v51 }
  0x9a   :  { %v596_v30 = vand.u32 4294901760, %v595_v41  ;;  %v8347_v62 = vsub.f32 %v350_v29, %v8344_v12  ;;  %v9095_v28 = vand.u32 4294901760, %v9084_v57  ;;  %v9096_v29 = vand.u32 4294901760, %v9085_v45 }
  0x9b   :  { %v353_v60 = vsel %vm106_vm0, %v294_v18, 0  ;;  %v9097_v53 = vand.u32 4294901760, %v9086_v22  ;;  %v9098_v41 = vand.u32 4294901760, %v8112_v50  ;;  %v9099_v18 = vand.u32 4294901760, %v9087_v32 }
  0x9c   :  { %6636 = vmatmul.mubr.f32.gmra.mrb[16].mxu0 %v596_v30  ;;  %v604_v61 = vand.u32 4294901760, %v8347_v62  ;;  %v8351_v5 = vand.u32 4294901760, %v353_v60  ;;  %v9101_v30 = vand.u32 4294901760, %v9089_v44 }
  0x9e   :  { %v605_v11 = vsub.f32 %v8347_v62, %v604_v61  ;;  %v8357_v25 = vsub.f32 %v353_v60, %v8351_v5  ;;  %v9102_v60 = vand.u32 4294901760, %v9090_v48 }
  0xa0   :  { %v606_v16 = vand.u32 4294901760, %v605_v11  ;;  %v614_v35 = vand.u32 4294901760, %v8357_v25  ;;  %v9103_v11 = vand.u32 4294901760, %v8222_v21 }
  0xa2   :  { %6638 = vmatprep.mubr.f32.mxu0 %v606_v16  ;;  %v615_v36 = vsub.f32 %v8357_v25, %v614_v35 }
  0xa4   :  { %v616_v37 = vand.u32 4294901760, %v615_v36 }
  0xa6   :  { %6639 = vmatmul.mubr.f32.gmra.mrb[18].mxu0 %v616_v37 }
  0xa7   :  { %6645 = vmatprep.mubr.f32.mxu0 %v7952_v58 }
  0xaa   :  { %6646 = vmatmul.mubr.f32.vlgmr.msra.gmra.mrb[0].mxu0 %v7968_v3 }
  0xab   :  { %6648 = vmatprep.mubr.f32.mxu0 %v7972_v15  ;;  %7242 = vmatpush3.bf16.msra.mxu0 %v7239_v49  ;;  %v9092_v49 = vand.u32 4294901760, %v9081_v27 }
  0xac   :  { %7244 = vmatprep.subr.bf16.mxu0 %v7881_v17 }
  0xae   :  { %6649 = vmatmul.mubr.f32.gmra.mrb[2].mxu0 %v7998_v46 }
  0xaf   :  { %6651 = vmatprep.mubr.f32.mxu0 %v8042_v56 }
  0xb2   :  { %6652 = vmatmul.mubr.f32.gmra.mrb[4].mxu0 %v8065_v59 }
  0xb3   :  { %6654 = vmatprep.mubr.f32.mxu0 %v9078_v34 }
  0xb6   :  { %6655 = vmatmul.mubr.f32.gmra.mrb[6].mxu0 %v9079_v38 }
  0xb7   :  { %6657 = vmatprep.mubr.f32.mxu0 %v8115_v19 }
  0xba   :  { %6658 = vmatmul.mubr.f32.gmra.mrb[8].mxu0 %v8152_v8 }
  0xbb   :  { %6660 = vmatprep.mubr.f32.mxu0 %v8166_v9 }
  0xbe   :  { %6661 = vmatmul.mubr.f32.gmra.mrb[10].mxu0 %v8189_v63 }
  0xbf   :  { %6663 = vmatprep.mubr.f32.mxu0 %v8211_v33 }
  0xc2   :  { %6664 = vmatmul.mubr.f32.gmra.mrb[12].mxu0 %v8233_v55 }
  0xc3   :  { %6666 = vmatprep.mubr.f32.mxu0 %v8253_v7 }
  0xc6   :  { %6667 = vmatmul.mubr.f32.gmra.mrb[14].mxu0 %v8277_v13 }
  0xc7   :  { %6669 = vmatprep.mubr.f32.mxu0 %v8290_v20 }
  0xca   :  { %6670 = vmatmul.mubr.f32.gmra.mrb[16].mxu0 %v8313_v31 }
  0xcb   :  { %6672 = vmatprep.mubr.f32.mxu0 %v8344_v12 }
  0xce   :  { %6673 = vmatmul.mubr.f32.gmra.mrb[18].mxu0 %v8351_v5 }
  0xcf   :  { %6679 = vmatprep.mubr.f32.mxu0 %v9080_v26 }
  0xd2   :  { %6680 = vmatmul.mubr.f32.vlgmr.msra.gmra.mrb[0].mxu0 %v9081_v27 }
  0xd3   :  { %6682 = vmatprep.mubr.f32.mxu0 %v9082_v42  ;;  %7246 = vmatpush3.bf16.msra.mxu0 %v7881_v17 }
  0xd4   :  { %7248 = vmatprep.subr.bf16.mxu0 %v8338_v52 }
  0xd6   :  { %6683 = vmatmul.mubr.f32.gmra.mrb[2].mxu0 %v9083_v51 }
  0xd7   :  { %6685 = vmatprep.mubr.f32.mxu0 %v9084_v57 }
  0xda   :  { %6686 = vmatmul.mubr.f32.gmra.mrb[4].mxu0 %v9085_v45 }
  0xdb   :  { %6688 = vmatprep.mubr.f32.mxu0 %v9086_v22 }
  0xde   :  { %6689 = vmatmul.mubr.f32.gmra.mrb[6].mxu0 %v8112_v50 }
  0xdf   :  { %6691 = vmatprep.mubr.f32.mxu0 %v9087_v32 }
  0xe2   :  { %6692 = vmatmul.mubr.f32.gmra.mrb[8].mxu0 %v9088_v43 }
  0xe3   :  { %6694 = vmatprep.mubr.f32.mxu0 %v9089_v44 }
  0xe6   :  { %6695 = vmatmul.mubr.f32.gmra.mrb[10].mxu0 %v9090_v48 }
  0xe7   :  { %6697 = vmatprep.mubr.f32.mxu0 %v8222_v21 }
  0xea   :  { %6698 = vmatmul.mubr.f32.gmra.mrb[12].mxu0 %v8244_v2 }
  0xeb   :  { %6700 = vmatprep.mubr.f32.mxu0 %v8267_v4 }
  0xee   :  { %6701 = vmatmul.mubr.f32.gmra.mrb[14].mxu0 %v8288_v47 }
  0xef   :  { %6703 = vmatprep.mubr.f32.mxu0 %v8301_v24 }
  0xf2   :  { %6704 = vmatmul.mubr.f32.gmra.mrb[16].mxu0 %v8326_v23 }
  0xf3   :  { %6706 = vmatprep.mubr.f32.mxu0 %v8347_v62 }
  0xf6   :  { %6707 = vmatmul.mubr.f32.gmra.mrb[18].mxu0 %v8357_v25 }
  0xf7   :  { %6713 = vmatprep.mubr.f32.mxu0 %v9091_v54 }
  0xfa   :  { %6714 = vmatmul.mubr.f32.vlgmr.msra.gmra.mrb[0].mxu0 %v9092_v49 }
  0xfb   :  { %6716 = vmatprep.mubr.f32.mxu0 %v9093_v6  ;;  %7250 = vmatpush3.bf16.msra.mxu0 %v8338_v52  ;;  %v9100_v52 = vand.u32 4294901760, %v9088_v43 }
  0xfc   :  { %7252 = vmatprep.subr.bf16.mxu0 %v7881_v17 }
  0xfe   :  { %6717 = vmatmul.mubr.f32.gmra.mrb[2].mxu0 %v9094_v10 }
  0xff   :  { %6719 = vmatprep.mubr.f32.mxu0 %v9095_v28 }
 0x102   :  { %6720 = vmatmul.mubr.f32.gmra.mrb[4].mxu0 %v9096_v29 }
 0x103   :  { %6722 = vmatprep.mubr.f32.mxu0 %v9097_v53 }
 0x106   :  { %6723 = vmatmul.mubr.f32.gmra.mrb[6].mxu0 %v9098_v41 }
 0x107   :  { %6725 = vmatprep.mubr.f32.mxu0 %v9099_v18 }
 0x10a   :  { %6726 = vmatmul.mubr.f32.gmra.mrb[8].mxu0 %v9100_v52 }
 0x10b   :  { %6728 = vmatprep.mubr.f32.mxu0 %v9101_v30 }
 0x10e   :  { %6729 = vmatmul.mubr.f32.gmra.mrb[10].mxu0 %v9102_v60 }
 0x10f   :  { %6731 = vmatprep.mubr.f32.mxu0 %v9103_v11 }
 0x112   :  { %6732 = vmatmul.mubr.f32.gmra.mrb[12].mxu0 %v554_v39 }
 0x113   :  { %6734 = vmatprep.mubr.f32.mxu0 %v564_v40 }
 0x116   :  { %6735 = vmatmul.mubr.f32.gmra.mrb[14].mxu0 %v574_v0 }
 0x117   :  { %6737 = vmatprep.mubr.f32.mxu0 %v584_v1 }
 0x11a   :  { %6738 = vmatmul.mubr.f32.gmra.mrb[16].mxu0 %v594_v14 }
 0x11b   :  { %6740 = vmatprep.mubr.f32.mxu0 %v604_v61 }
 0x11e   :  { %6741 = vmatmul.mubr.f32.gmra.mrb[18].mxu0 %v614_v35 }
 0x11f   :  { %6747 = vmatprep.mubr.f32.mxu0 %v7952_v58 }
 0x122   :  { %6748 = vmatmul.mubr.f32.vlgmr.msra.gmra.mrb[0].mxu0 %v7968_v3 }
 0x123   :  { %6750 = vmatprep.mubr.f32.mxu0 %v7972_v15  ;;  %7254 = vmatpush3.bf16.msra.mxu0 %v7881_v17  ;;  %v7767_v17 = vmov 0.0|0.0  }
 0x124   :  { %7255 = vmatprep.subr.bf16.mxu1 %v7767_v17 }
 0x126   :  { %6751 = vmatmul.mubr.f32.gmra.mrb[2].mxu0 %v7998_v46 }
 0x127   :  { %6753 = vmatprep.mubr.f32.mxu0 %v8042_v56 }
 0x12a   :  { %6754 = vmatmul.mubr.f32.gmra.mrb[4].mxu0 %v8065_v59 }
 0x12b   :  { %6756 = vmatprep.mubr.f32.mxu0 %v9078_v34 }
 0x12e   :  { %6757 = vmatmul.mubr.f32.gmra.mrb[6].mxu0 %v9079_v38 }
 0x12f   :  { %6759 = vmatprep.mubr.f32.mxu0 %v8115_v19 }
 0x132   :  { %6760 = vmatmul.mubr.f32.gmra.mrb[8].mxu0 %v8152_v8 }
 0x133   :  { %6762 = vmatprep.mubr.f32.mxu0 %v8166_v9 }
 0x136   :  { %6763 = vmatmul.mubr.f32.gmra.mrb[10].mxu0 %v8189_v63 }
 0x137   :  { %6765 = vmatprep.mubr.f32.mxu0 %v8211_v33 }
 0x13a   :  { %6766 = vmatmul.mubr.f32.gmra.mrb[12].mxu0 %v8233_v55 }
 0x13b   :  { %6768 = vmatprep.mubr.f32.mxu0 %v8253_v7 }
 0x13e   :  { %6769 = vmatmul.mubr.f32.gmra.mrb[14].mxu0 %v8277_v13 }
 0x13f   :  { %6771 = vmatprep.mubr.f32.mxu0 %v8290_v20 }
 0x142   :  { %6772 = vmatmul.mubr.f32.gmra.mrb[16].mxu0 %v8313_v31 }
 0x143   :  { %6774 = vmatprep.mubr.f32.mxu0 %v8344_v12 }
 0x146   :  { %6775 = vmatmul.mubr.f32.gmra.mrb[18].mxu0 %v8351_v5 }
 0x147   :  { %6781 = vmatprep.mubr.f32.mxu0 %v7952_v58  ;;  %v7769_v58 = vmov 0.0  }
 0x148   :  { %6815 = vmatprep.mubr.msk.f32.mxu1 %vm7768_vm1, %v7769_v58 }
 0x14a   :  { %6782 = vmatmul.mubr.f32.vlgmr.msra.gmra.mrb[0].mxu0 %v7968_v3  ;;  %v103_v3 = vld [vmem:[#allocation7] sm:$0x3f] }
 0x14b   :  { %6784 = vmatprep.mubr.f32.mxu0 %v7972_v15  ;;  %v1632_v15 = vsel %vm106_vm0, %v103_v3, 0 }
 0x14e   :  { %6785 = vmatmul.mubr.f32.gmra.mrb[2].mxu0 %v7998_v46  ;;  %v8493_v46 = vand.u32 4294901760, %v1632_v15 }
 0x14f   :  { %6787 = vmatprep.mubr.f32.mxu0 %v8042_v56 }
 0x150   :  { %v8496_v56 = vsub.f32 %v1632_v15, %v8493_v46 }
 0x152   :  { %6788 = vmatmul.mubr.f32.gmra.mrb[4].mxu0 %v8065_v59  ;;  %v8499_v59 = vand.u32 4294901760, %v8496_v56 }
 0x153   :  { %6790 = vmatprep.mubr.f32.mxu0 %v9078_v34 }
 0x156   :  { %6791 = vmatmul.mubr.f32.gmra.mrb[6].mxu0 %v9079_v38 }
 0x157   :  { %6793 = vmatprep.mubr.f32.mxu0 %v8115_v19 }
 0x15a   :  { %6794 = vmatmul.mubr.f32.gmra.mrb[8].mxu0 %v8152_v8 }
 0x15b   :  { %6796 = vmatprep.mubr.f32.mxu0 %v8166_v9  ;;  %v1704_v9 = vsub.f32 %v8496_v56, %v8499_v59 }
 0x15d   :  { %v8510_v40 = vand.u32 4294901760, %v1704_v9 }
 0x15e   :  { %6797 = vmatmul.mubr.f32.gmra.mrb[10].mxu0 %v8189_v63 }
 0x15f   :  { %6799 = vmatprep.mubr.f32.mxu0 %v8211_v33 }
 0x162   :  { %6800 = vmatmul.mubr.f32.gmra.mrb[12].mxu0 %v8233_v55 }
 0x163   :  { %6802 = vmatprep.mubr.f32.mxu0 %v8253_v7 }
 0x166   :  { %6803 = vmatmul.mubr.f32.gmra.mrb[14].mxu0 %v8277_v13 }
 0x167   :  { %6805 = vmatprep.mubr.f32.mxu0 %v8290_v20 }
 0x16a   :  { %6806 = vmatmul.mubr.f32.gmra.mrb[16].mxu0 %v8313_v31 }
 0x16b   :  { %6808 = vmatprep.mubr.f32.mxu0 %v8344_v12 }
 0x16e   :  { %6809 = vmatmul.mubr.f32.gmra.mrb[18].mxu0 %v8351_v5 }
 0x21d   :  { %v6783_v19 = vpop.f32.mrb[0].mxu0 }
 0x21e   :  { %v1638_v50 = vand.u32 4294901760, %v6783_v19  ;;  %v1513_v8 = vpop.f32.mrb[1].mxu0 }
 0x21f   :  { %v1635_v63 = vand.u32 4294901760, %v1513_v8 }
 0x220   :  { %v8503_v55 = vsub.f32 %v6783_v19, %v1638_v50 }
 0x221   :  { %v8505_v33 = vpack.c.bf16 %v1638_v50, %v1635_v63  ;;  %v8507_v21 = vsub.f32 %v1513_v8, %v1635_v63  ;;  %v6786_v2 = vpop.f32.mrb[2].mxu0 }
 0x222   :  { %v1721_v39 = vand.u32 4294901760, %v8503_v55  ;;  %v2097_v7 = vand.u32 4294901760, %v6786_v2  ;;  %v1525_v4 = vpop.f32.mrb[3].mxu0 }
 0x223   :  { %v1714_v13 = vand.u32 4294901760, %v8507_v21  ;;  %v7262_v47 = vpack.c.bf16 %v8503_v55, %v8507_v21  ;;  %v2094_v20 = vand.u32 4294901760, %v1525_v4  ;;  %7257 = vmatpush3.bf16.msra.mxu1 %v8505_v33 }
 0x224   :  { %v1722_v0 = vsub.f32 %v8503_v55, %v1721_v39  ;;  %v8517_v24 = vsub.f32 %v6786_v2, %v2097_v7  ;;  %7258 = vmatprep.subr.bf16.mxu1 %v7767_v17 }
 0x225   :  { %v1715_v1 = vsub.f32 %v8507_v21, %v1714_v13  ;;  %v8521_v31 = vpack.c.bf16 %v2097_v7, %v2094_v20  ;;  %v8523_v23 = vsub.f32 %v1525_v4, %v2094_v20  ;;  %v6789_v14 = vpop.f32.mrb[4].mxu0  ;;  %v8525_v12 = vpack.c.bf16 %v1721_v39, %v1714_v13 }
 0x226   :  { %v1723_v62 = vand.u32 4294901760, %v1722_v0  ;;  %v2180_v61 = vand.u32 4294901760, %v8517_v24  ;;  %v2556_v5 = vand.u32 4294901760, %v6789_v14  ;;  %v1537_v25 = vpop.f32.mrb[5].mxu0  ;;  %6816 = vmatmul.mubr.f32.vlgmr.msra.gmra.mrb[0].mxu1 %v8510_v40 }
 0x227   :  { %v1716_v16 = vand.u32 4294901760, %v1715_v1  ;;  %v2173_v35 = vand.u32 4294901760, %v8523_v23  ;;  %v7280_v36 = vpack.c.bf16 %v8517_v24, %v8523_v23  ;;  %v2553_v37 = vand.u32 4294901760, %v1537_v25  ;;  %6822 = vmatprep.mubr.msk.f32.mxu1 %vm7768_vm1, %v7769_v58 }
 0x228   :  { %v2181_v34 = vsub.f32 %v8517_v24, %v2180_v61  ;;  %v8535_v38 = vsub.f32 %v6789_v14, %v2556_v5 }
 0x229   :  { %v2174_v26 = vsub.f32 %v8523_v23, %v2173_v35  ;;  %v8538_v27 = vpack.c.bf16 %v2556_v5, %v2553_v37  ;;  %v8540_v42 = vsub.f32 %v1537_v25, %v2553_v37  ;;  %v6792_v51 = vpop.f32.mrb[6].mxu0  ;;  %v7259_v57 = vpack.c.bf16 %v1723_v62, %v1716_v16 }
 0x22a   :  { %v2182_v45 = vand.u32 4294901760, %v2181_v34  ;;  %v2639_v22 = vand.u32 4294901760, %v8535_v38  ;;  %v3015_v32 = vand.u32 4294901760, %v6792_v51  ;;  %v1549_v43 = vpop.f32.mrb[7].mxu0  ;;  %v8543_v44 = vpack.c.bf16 %v2180_v61, %v2173_v35 }
 0x22b   :  { %v2175_v48 = vand.u32 4294901760, %v2174_v26  ;;  %v2632_v54 = vand.u32 4294901760, %v8540_v42  ;;  %v3012_v6 = vand.u32 4294901760, %v1549_v43  ;;  %7260 = vmatpush3.bf16.msra.mxu1 %v7259_v57 }
 0x22c   :  { %v2640_v10 = vsub.f32 %v8535_v38, %v2639_v22  ;;  %v8549_v28 = vsub.f32 %v6792_v51, %v3015_v32  ;;  %7261 = vmatprep.subr.bf16.mxu1 %v7767_v17 }
 0x22d   :  { %v2633_v29 = vsub.f32 %v8540_v42, %v2632_v54  ;;  %v8553_v53 = vpack.c.bf16 %v3015_v32, %v3012_v6  ;;  %v8555_v41 = vsub.f32 %v1549_v43, %v3012_v6  ;;  %v6795_v18 = vpop.f32.mrb[8].mxu0  ;;  %v8557_v52 = vpack.c.bf16 %v2182_v45, %v2175_v48 }
 0x22e   :  { %v2641_v30 = vand.u32 4294901760, %v2640_v10  ;;  %v3098_v60 = vand.u32 4294901760, %v8549_v28  ;;  %v3474_v11 = vand.u32 4294901760, %v6795_v18  ;;  %v1561_v3 = vpop.f32.mrb[9].mxu0  ;;  %6823 = vmatmul.mubr.f32.vlgmr.msra.gmra.mrb[0].mxu1 %v8493_v46  ;;  %v8561_v15 = vpack.c.bf16 %v2639_v22, %v2632_v54 }
 0x22f   :  { %v2634_v19 = vand.u32 4294901760, %v2633_v29  ;;  %v3091_v50 = vand.u32 4294901760, %v8555_v41  ;;  %v3471_v9 = vand.u32 4294901760, %v1561_v3  ;;  %7263 = vmatpush3.bf16.msra.mxu1 %v7262_v47  ;;  %6829 = vmatprep.mubr.msk.f32.mxu1 %vm7768_vm1, %v7769_v58  ;;  %v9105_v24 = vpack.c.bf16 %v8549_v28, %v8555_v41 }
 0x230   :  { %v3099_v63 = vsub.f32 %v8549_v28, %v3098_v60  ;;  %v8569_v55 = vsub.f32 %v6795_v18, %v3474_v11  ;;  %7264 = vmatprep.subr.bf16.mxu1 %v7767_v17 }
 0x231   :  { %v3092_v21 = vsub.f32 %v8555_v41, %v3091_v50  ;;  %v8573_v2 = vpack.c.bf16 %v3474_v11, %v3471_v9  ;;  %v8575_v39 = vsub.f32 %v1561_v3, %v3471_v9  ;;  %v6798_v7 = vpop.f32.mrb[10].mxu0  ;;  %v8577_v4 = vpack.c.bf16 %v2641_v30, %v2634_v19 }
 0x232   :  { %v3100_v13 = vand.u32 4294901760, %v3099_v63  ;;  %v3557_v47 = vand.u32 4294901760, %v8569_v55  ;;  %v3933_v20 = vand.u32 4294901760, %v6798_v7  ;;  %v1573_v0 = vpop.f32.mrb[11].mxu0  ;;  %v8580_v1 = vpack.c.bf16 %v3098_v60, %v3091_v50 }
 0x233   :  { %v3093_v14 = vand.u32 4294901760, %v3092_v21  ;;  %v3550_v62 = vand.u32 4294901760, %v8575_v39  ;;  %v3930_v5 = vand.u32 4294901760, %v1573_v0 }
 0x234   :  { %v3558_v25 = vsub.f32 %v8569_v55, %v3557_v47  ;;  %v8586_v16 = vsub.f32 %v6798_v7, %v3933_v20 }
 0x235   :  { %v3551_v35 = vsub.f32 %v8575_v39, %v3550_v62  ;;  %v8589_v37 = vpack.c.bf16 %v3933_v20, %v3930_v5  ;;  %v8591_v34 = vsub.f32 %v1573_v0, %v3930_v5  ;;  %v6801_v26 = vpop.f32.mrb[12].mxu0  ;;  %v8593_v51 = vpack.c.bf16 %v3100_v13, %v3093_v14 }
 0x236   :  { %v3559_v57 = vand.u32 4294901760, %v3558_v25  ;;  %v4016_v45 = vand.u32 4294901760, %v8586_v16  ;;  %v4392_v22 = vand.u32 4294901760, %v6801_v26  ;;  %v1585_v32 = vpop.f32.mrb[13].mxu0  ;;  %6830 = vmatmul.mubr.f32.vlgmr.msra.gmra.mrb[0].mxu1 %v8496_v56  ;;  %v8597_v43 = vpack.c.bf16 %v3557_v47, %v3550_v62 }
 0x237   :  { %v3552_v48 = vand.u32 4294901760, %v3551_v35  ;;  %v4009_v54 = vand.u32 4294901760, %v8591_v34  ;;  %v4389_v10 = vand.u32 4294901760, %v1585_v32  ;;  %7266 = vmatpush3.bf16.msra.mxu1 %v8505_v33  ;;  %6836 = vmatprep.mubr.msk.f32.mxu1 %vm7768_vm1, %v7769_v58  ;;  %v9107_v23 = vpack.c.bf16 %v8586_v16, %v8591_v34 }
 0x238   :  { %v4017_v29 = vsub.f32 %v8586_v16, %v4016_v45  ;;  %v8606_v18 = vsub.f32 %v6801_v26, %v4392_v22  ;;  %7267 = vmatprep.subr.bf16.mxu1 %v7767_v17 }
 0x239   :  { %v4010_v30 = vsub.f32 %v8591_v34, %v4009_v54  ;;  %v8610_v60 = vpack.c.bf16 %v4392_v22, %v4389_v10  ;;  %v8612_v11 = vsub.f32 %v1585_v32, %v4389_v10  ;;  %v6804_v3 = vpop.f32.mrb[14].mxu0  ;;  %v8614_v19 = vpack.c.bf16 %v3559_v57, %v3552_v48 }
 0x23a   :  { %v4018_v50 = vand.u32 4294901760, %v4017_v29  ;;  %v4475_v9 = vand.u32 4294901760, %v8606_v18  ;;  %v4851_v63 = vand.u32 4294901760, %v6804_v3  ;;  %v1597_v21 = vpop.f32.mrb[15].mxu0  ;;  %v8617_v7 = vpack.c.bf16 %v4016_v45, %v4009_v54 }
 0x23b   :  { %v4011_v13 = vand.u32 4294901760, %v4010_v30  ;;  %v4468_v47 = vand.u32 4294901760, %v8612_v11  ;;  %v4848_v0 = vand.u32 4294901760, %v1597_v21 }
 0x23c   :  { %v4476_v14 = vsub.f32 %v8606_v18, %v4475_v9  ;;  %v8623_v62 = vsub.f32 %v6804_v3, %v4851_v63 }
 0x23d   :  { %v4469_v5 = vsub.f32 %v8612_v11, %v4468_v47  ;;  %v8626_v25 = vpack.c.bf16 %v4851_v63, %v4848_v0  ;;  %v8628_v35 = vsub.f32 %v1597_v21, %v4848_v0  ;;  %v6807_v26 = vpop.f32.mrb[16].mxu0  ;;  %v8630_v57 = vpack.c.bf16 %v4018_v50, %v4011_v13 }
 0x23e   :  { %v4477_v45 = vand.u32 4294901760, %v4476_v14  ;;  %v4934_v22 = vand.u32 4294901760, %v8623_v62  ;;  %v5310_v32 = vand.u32 4294901760, %v6807_v26  ;;  %v1609_v48 = vpop.f32.mrb[17].mxu0  ;;  %6837 = vmatmul.mubr.f32.vlgmr.msra.gmra.mrb[0].mxu1 %v8499_v59  ;;  %v8634_v54 = vpack.c.bf16 %v4475_v9, %v4468_v47 }
 0x23f   :  { %v4470_v10 = vand.u32 4294901760, %v4469_v5  ;;  %v4927_v29 = vand.u32 4294901760, %v8628_v35  ;;  %v5307_v3 = vand.u32 4294901760, %v1609_v48  ;;  %7269 = vmatpush3.bf16.msra.mxu1 %v8525_v12  ;;  %6843 = vmatprep.mubr.msk.f32.mxu1 %vm7768_vm1, %v7769_v58 }
 0x240   :  { %v4935_v50 = vsub.f32 %v8623_v62, %v4934_v22  ;;  %v8643_v63 = vsub.f32 %v6807_v26, %v5310_v32  ;;  %7270 = vmatprep.subr.bf16.mxu1 %v7767_v17 }
 0x241   :  { %v4928_v9 = vsub.f32 %v8628_v35, %v4927_v29  ;;  %v8647_v21 = vpack.c.bf16 %v5310_v32, %v5307_v3  ;;  %v8649_v13 = vsub.f32 %v1609_v48, %v5307_v3  ;;  %v6810_v47 = vpop.f32.mrb[18].mxu0  ;;  %v8651_v0 = vpack.c.bf16 %v4477_v45, %v4470_v10 }
 0x242   :  { %v4936_v14 = vand.u32 4294901760, %v4935_v50  ;;  %v5393_v12 = vand.u32 4294901760, %v8643_v63  ;;  %v5769_v5 = vand.u32 4294901760, %v6810_v47  ;;  %v1621_v30 = vpop.f32.mrb[19].mxu0  ;;  %v8654_v20 = vpack.c.bf16 %v4934_v22, %v4927_v29 }
 0x243   :  { %v4929_v26 = vand.u32 4294901760, %v4928_v9  ;;  %v5386_v6 = vand.u32 4294901760, %v8649_v13  ;;  %v5766_v32 = vand.u32 4294901760, %v1621_v30 }
 0x244   :  { %v5394_v48 = vsub.f32 %v8643_v63, %v5393_v12  ;;  %v8660_v3 = vsub.f32 %v6810_v47, %v5769_v5 }
 0x245   :  { %v5387_v45 = vsub.f32 %v8649_v13, %v5386_v6  ;;  %v8663_v10 = vpack.c.bf16 %v5769_v5, %v5766_v32  ;;  %v8665_v50 = vsub.f32 %v1621_v30, %v5766_v32  ;;  %v8667_v8 = vpack.c.bf16 %v4936_v14, %v4929_v26 }
 0x246   :  { %v5395_v22 = vand.u32 4294901760, %v5394_v48  ;;  %v5852_v29 = vand.u32 4294901760, %v8660_v3  ;;  %6844 = vmatmul.mubr.f32.vlgmr.msra.gmra.mrb[0].mxu1 %v8493_v46  ;;  %v8671_v9 = vpack.c.bf16 %v5393_v12, %v5386_v6 }
 0x247   :  { %v5388_v61 = vand.u32 4294901760, %v5387_v45  ;;  %v5845_v49 = vand.u32 4294901760, %v8665_v50  ;;  %v7424_v47 = vpack.c.bf16 %v8660_v3, %v8665_v50  ;;  %7272 = vmatpush3.bf16.msra.mxu1 %v8505_v33  ;;  %6850 = vmatprep.mubr.msk.f32.mxu1 %vm7768_vm1, %v7769_v58  ;;  %v9104_v33 = vpack.c.bf16 %v8535_v38, %v8540_v42 }
 0x248   :  { %v5853_v30 = vsub.f32 %v8660_v3, %v5852_v29  ;;  %7273 = vmatprep.subr.bf16.mxu1 %v7767_v17 }
 0x249   :  { %v5846_v14 = vsub.f32 %v8665_v50, %v5845_v49  ;;  %v8682_v5 = vpack.c.bf16 %v5852_v29, %v5845_v49  ;;  %v8684_v6 = vpack.c.bf16 %v5395_v22, %v5388_v61  ;;  %v9109_v49 = vpack.c.bf16 %v8623_v62, %v8628_v35 }
 0x24a   :  { %v5854_v12 = vand.u32 4294901760, %v5853_v30 }
 0x24b   :  { %v5847_v26 = vand.u32 4294901760, %v5846_v14 }
 0x24d   :  { %v8686_v32 = vpack.c.bf16 %v5854_v12, %v5847_v26 }
 0x24e   :  { %6851 = vmatmul.mubr.f32.vlgmr.msra.gmra.mrb[0].mxu1 %v8493_v46 }
 0x24f   :  { %7275 = vmatpush3.bf16.msra.mxu1 %v8521_v31  ;;  %6857 = vmatprep.mubr.msk.f32.mxu1 %vm7768_vm1, %v7769_v58 }
 0x250   :  { %7276 = vmatprep.subr.bf16.mxu1 %v7767_v17 }
 0x252   :  { %6858 = vmatmul.mubr.f32.vlgmr.msra.gmra.mrb[2].mxu1 %v8510_v40 }
 0x253   :  { %7278 = vmatpush3.bf16.msra.mxu1 %v8557_v52  ;;  %6864 = vmatprep.mubr.msk.f32.mxu1 %vm7768_vm1, %v7769_v58 }
 0x254   :  { %7279 = vmatprep.subr.bf16.mxu1 %v7767_v17 }
 0x25a   :  { %6865 = vmatmul.mubr.f32.vlgmr.msra.gmra.mrb[2].mxu1 %v8493_v46 }
 0x25b   :  { %7281 = vmatpush3.bf16.msra.mxu1 %v7280_v36  ;;  %6871 = vmatprep.mubr.msk.f32.mxu1 %vm7768_vm1, %v7769_v58 }
 0x25c   :  { %7282 = vmatprep.subr.bf16.mxu1 %v7767_v17 }
 0x262   :  { %6872 = vmatmul.mubr.f32.vlgmr.msra.gmra.mrb[2].mxu1 %v8496_v56 }
 0x263   :  { %7284 = vmatpush3.bf16.msra.mxu1 %v8521_v31  ;;  %6878 = vmatprep.mubr.msk.f32.mxu1 %vm7768_vm1, %v7769_v58 }
 0x264   :  { %7285 = vmatprep.subr.bf16.mxu1 %v7767_v17 }
 0x26a   :  { %6879 = vmatmul.mubr.f32.vlgmr.msra.gmra.mrb[2].mxu1 %v8499_v59 }
 0x26b   :  { %7287 = vmatpush3.bf16.msra.mxu1 %v8543_v44  ;;  %6885 = vmatprep.mubr.msk.f32.mxu1 %vm7768_vm1, %v7769_v58 }
 0x26c   :  { %7288 = vmatprep.subr.bf16.mxu1 %v7767_v17 }
 0x272   :  { %6886 = vmatmul.mubr.f32.vlgmr.msra.gmra.mrb[2].mxu1 %v8493_v46 }
 0x273   :  { %7290 = vmatpush3.bf16.msra.mxu1 %v8521_v31  ;;  %6892 = vmatprep.mubr.msk.f32.mxu1 %vm7768_vm1, %v7769_v58  ;;  %v9106_v31 = vpack.c.bf16 %v8569_v55, %v8575_v39  ;;  %v9110_v39 = vpack.c.bf16 %v8643_v63, %v8649_v13 }
 0x274   :  { %7291 = vmatprep.subr.bf16.mxu1 %v7767_v17 }
 0x27a   :  { %6893 = vmatmul.mubr.f32.vlgmr.msra.gmra.mrb[2].mxu1 %v8493_v46 }
 0x27b   :  { %7293 = vmatpush3.bf16.msra.mxu1 %v8538_v27  ;;  %6899 = vmatprep.mubr.msk.f32.mxu1 %vm7768_vm1, %v7769_v58 }
 0x27c   :  { %7294 = vmatprep.subr.bf16.mxu1 %v7767_v17 }
 0x27e   :  { %6900 = vmatmul.mubr.f32.vlgmr.msra.gmra.mrb[4].mxu1 %v8510_v40 }
 0x27f   :  { %7296 = vmatpush3.bf16.msra.mxu1 %v8577_v4  ;;  %6906 = vmatprep.mubr.msk.f32.mxu1 %vm7768_vm1, %v7769_v58 }
 0x280   :  { %7297 = vmatprep.subr.bf16.mxu1 %v7767_v17 }
 0x286   :  { %6907 = vmatmul.mubr.f32.vlgmr.msra.gmra.mrb[4].mxu1 %v8493_v46 }
 0x287   :  { %7299 = vmatpush3.bf16.msra.mxu1 %v9104_v33  ;;  %6913 = vmatprep.mubr.msk.f32.mxu1 %vm7768_vm1, %v7769_v58 }
 0x288   :  { %7300 = vmatprep.subr.bf16.mxu1 %v7767_v17 }
 0x28e   :  { %6914 = vmatmul.mubr.f32.vlgmr.msra.gmra.mrb[4].mxu1 %v8496_v56 }
 0x28f   :  { %7302 = vmatpush3.bf16.msra.mxu1 %v8538_v27  ;;  %6920 = vmatprep.mubr.msk.f32.mxu1 %vm7768_vm1, %v7769_v58 }
 0x290   :  { %7303 = vmatprep.subr.bf16.mxu1 %v7767_v17 }
 0x296   :  { %6921 = vmatmul.mubr.f32.vlgmr.msra.gmra.mrb[4].mxu1 %v8499_v59 }
 0x297   :  { %7305 = vmatpush3.bf16.msra.mxu1 %v8561_v15  ;;  %6927 = vmatprep.mubr.msk.f32.mxu1 %vm7768_vm1, %v7769_v58 }
 0x298   :  { %7306 = vmatprep.subr.bf16.mxu1 %v7767_v17 }
 0x29e   :  { %6928 = vmatmul.mubr.f32.vlgmr.msra.gmra.mrb[4].mxu1 %v8493_v46 }
 0x29f   :  { %7308 = vmatpush3.bf16.msra.mxu1 %v8538_v27  ;;  %6934 = vmatprep.mubr.msk.f32.mxu1 %vm7768_vm1, %v7769_v58  ;;  %v9108_v27 = vpack.c.bf16 %v8606_v18, %v8612_v11 }
 0x2a0   :  { %7309 = vmatprep.subr.bf16.mxu1 %v7767_v17 }
 0x2a6   :  { %6935 = vmatmul.mubr.f32.vlgmr.msra.gmra.mrb[4].mxu1 %v8493_v46 }
 0x2a7   :  { %7311 = vmatpush3.bf16.msra.mxu1 %v8553_v53  ;;  %6941 = vmatprep.mubr.msk.f32.mxu1 %vm7768_vm1, %v7769_v58 }
 0x2a8   :  { %7312 = vmatprep.subr.bf16.mxu1 %v7767_v17 }
 0x2aa   :  { %6942 = vmatmul.mubr.f32.vlgmr.msra.gmra.mrb[6].mxu1 %v8510_v40 }
 0x2ab   :  { %7314 = vmatpush3.bf16.msra.mxu1 %v8593_v51  ;;  %6948 = vmatprep.mubr.msk.f32.mxu1 %vm7768_vm1, %v7769_v58 }
 0x2ac   :  { %7315 = vmatprep.subr.bf16.mxu1 %v7767_v17 }
 0x2b2   :  { %6949 = vmatmul.mubr.f32.vlgmr.msra.gmra.mrb[6].mxu1 %v8493_v46 }
 0x2b3   :  { %7317 = vmatpush3.bf16.msra.mxu1 %v9105_v24  ;;  %6955 = vmatprep.mubr.msk.f32.mxu1 %vm7768_vm1, %v7769_v58 }
 0x2b4   :  { %7318 = vmatprep.subr.bf16.mxu1 %v7767_v17 }
 0x2ba   :  { %6956 = vmatmul.mubr.f32.vlgmr.msra.gmra.mrb[6].mxu1 %v8496_v56 }
 0x2bb   :  { %7320 = vmatpush3.bf16.msra.mxu1 %v8553_v53  ;;  %6962 = vmatprep.mubr.msk.f32.mxu1 %vm7768_vm1, %v7769_v58 }
 0x2bc   :  { %7321 = vmatprep.subr.bf16.mxu1 %v7767_v17 }
 0x2c2   :  { %6963 = vmatmul.mubr.f32.vlgmr.msra.gmra.mrb[6].mxu1 %v8499_v59 }
 0x2c3   :  { %7323 = vmatpush3.bf16.msra.mxu1 %v8580_v1  ;;  %6969 = vmatprep.mubr.msk.f32.mxu1 %vm7768_vm1, %v7769_v58 }
 0x2c4   :  { %7324 = vmatprep.subr.bf16.mxu1 %v7767_v17 }
 0x2ca   :  { %6970 = vmatmul.mubr.f32.vlgmr.msra.gmra.mrb[6].mxu1 %v8493_v46 }
 0x2cb   :  { %7326 = vmatpush3.bf16.msra.mxu1 %v8553_v53  ;;  %6976 = vmatprep.mubr.msk.f32.mxu1 %vm7768_vm1, %v7769_v58 }
 0x2cc   :  { %7327 = vmatprep.subr.bf16.mxu1 %v7767_v17 }
 0x2d2   :  { %6977 = vmatmul.mubr.f32.vlgmr.msra.gmra.mrb[6].mxu1 %v8493_v46 }
 0x2d3   :  { %7329 = vmatpush3.bf16.msra.mxu1 %v8573_v2  ;;  %6983 = vmatprep.mubr.msk.f32.mxu1 %vm7768_vm1, %v7769_v58 }
 0x2d4   :  { %7330 = vmatprep.subr.bf16.mxu1 %v7767_v17 }
 0x2d6   :  { %6984 = vmatmul.mubr.f32.vlgmr.msra.gmra.mrb[8].mxu1 %v8510_v40 }
 0x2d7   :  { %7332 = vmatpush3.bf16.msra.mxu1 %v8614_v19  ;;  %6990 = vmatprep.mubr.msk.f32.mxu1 %vm7768_vm1, %v7769_v58 }
 0x2d8   :  { %7333 = vmatprep.subr.bf16.mxu1 %v7767_v17 }
 0x2de   :  { %6991 = vmatmul.mubr.f32.vlgmr.msra.gmra.mrb[8].mxu1 %v8493_v46 }
 0x2df   :  { %7335 = vmatpush3.bf16.msra.mxu1 %v9106_v31  ;;  %6997 = vmatprep.mubr.msk.f32.mxu1 %vm7768_vm1, %v7769_v58 }
 0x2e0   :  { %7336 = vmatprep.subr.bf16.mxu1 %v7767_v17 }
 0x2e6   :  { %6998 = vmatmul.mubr.f32.vlgmr.msra.gmra.mrb[8].mxu1 %v8496_v56 }
 0x2e7   :  { %7338 = vmatpush3.bf16.msra.mxu1 %v8573_v2  ;;  %7004 = vmatprep.mubr.msk.f32.mxu1 %vm7768_vm1, %v7769_v58 }
 0x2e8   :  { %7339 = vmatprep.subr.bf16.mxu1 %v7767_v17 }
 0x2ee   :  { %7005 = vmatmul.mubr.f32.vlgmr.msra.gmra.mrb[8].mxu1 %v8499_v59 }
 0x2ef   :  { %7341 = vmatpush3.bf16.msra.mxu1 %v8597_v43  ;;  %7011 = vmatprep.mubr.msk.f32.mxu1 %vm7768_vm1, %v7769_v58 }
 0x2f0   :  { %7342 = vmatprep.subr.bf16.mxu1 %v7767_v17 }
 0x2f6   :  { %7012 = vmatmul.mubr.f32.vlgmr.msra.gmra.mrb[8].mxu1 %v8493_v46 }
 0x2f7   :  { %7344 = vmatpush3.bf16.msra.mxu1 %v8573_v2  ;;  %7018 = vmatprep.mubr.msk.f32.mxu1 %vm7768_vm1, %v7769_v58 }
 0x2f8   :  { %7345 = vmatprep.subr.bf16.mxu1 %v7767_v17 }
 0x2fe   :  { %7019 = vmatmul.mubr.f32.vlgmr.msra.gmra.mrb[8].mxu1 %v8493_v46 }
 0x2ff   :  { %7347 = vmatpush3.bf16.msra.mxu1 %v8589_v37  ;;  %7025 = vmatprep.mubr.msk.f32.mxu1 %vm7768_vm1, %v7769_v58 }
 0x300   :  { %7348 = vmatprep.subr.bf16.mxu1 %v7767_v17 }
 0x302   :  { %7026 = vmatmul.mubr.f32.vlgmr.msra.gmra.mrb[10].mxu1 %v8510_v40 }
 0x303   :  { %7350 = vmatpush3.bf16.msra.mxu1 %v8630_v57  ;;  %7032 = vmatprep.mubr.msk.f32.mxu1 %vm7768_vm1, %v7769_v58 }
 0x304   :  { %7351 = vmatprep.subr.bf16.mxu1 %v7767_v17 }
 0x30a   :  { %7033 = vmatmul.mubr.f32.vlgmr.msra.gmra.mrb[10].mxu1 %v8493_v46 }
 0x30b   :  { %7353 = vmatpush3.bf16.msra.mxu1 %v9107_v23  ;;  %7039 = vmatprep.mubr.msk.f32.mxu1 %vm7768_vm1, %v7769_v58 }
 0x30c   :  { %7354 = vmatprep.subr.bf16.mxu1 %v7767_v17 }
 0x312   :  { %7040 = vmatmul.mubr.f32.vlgmr.msra.gmra.mrb[10].mxu1 %v8496_v56 }
 0x313   :  { %7356 = vmatpush3.bf16.msra.mxu1 %v8589_v37  ;;  %7046 = vmatprep.mubr.msk.f32.mxu1 %vm7768_vm1, %v7769_v58 }
 0x314   :  { %7357 = vmatprep.subr.bf16.mxu1 %v7767_v17 }
 0x31a   :  { %7047 = vmatmul.mubr.f32.vlgmr.msra.gmra.mrb[10].mxu1 %v8499_v59 }
 0x31b   :  { %7359 = vmatpush3.bf16.msra.mxu1 %v8617_v7  ;;  %7053 = vmatprep.mubr.msk.f32.mxu1 %vm7768_vm1, %v7769_v58 }
 0x31c   :  { %7360 = vmatprep.subr.bf16.mxu1 %v7767_v17 }
 0x321   :  { %v2089_v36 = vpop.f32.mrb[0].mxu1 }
 0x322   :  { %v6852_v38 = vpop.f32.mrb[1].mxu1  ;;  %7054 = vmatmul.mubr.f32.vlgmr.msra.gmra.mrb[10].mxu1 %v8493_v46  ;;  %v6248_v28 = vmul.f32 2.0, %v2089_v36  ;;  %v8912_v15 = vmul.f32 %v2089_v36, %v2089_v36 }
 0x323   :  { %7362 = vmatpush3.bf16.msra.mxu1 %v8589_v37  ;;  %7060 = vmatprep.mubr.msk.f32.mxu1 %vm7768_vm1, %v7769_v58 }
 0x324   :  { %7363 = vmatprep.subr.bf16.mxu1 %v7767_v17 }
 0x32a   :  { %7061 = vmatmul.mubr.f32.vlgmr.msra.gmra.mrb[10].mxu1 %v8493_v46 }
 0x32b   :  { %7365 = vmatpush3.bf16.msra.mxu1 %v8610_v60  ;;  %7067 = vmatprep.mubr.msk.f32.mxu1 %vm7768_vm1, %v7769_v58 }
 0x32c   :  { %7366 = vmatprep.subr.bf16.mxu1 %v7767_v17 }
 0x32e   :  { %7068 = vmatmul.mubr.f32.vlgmr.msra.gmra.mrb[12].mxu1 %v8510_v40 }
 0x32f   :  { %7368 = vmatpush3.bf16.msra.mxu1 %v8651_v0  ;;  %7074 = vmatprep.mubr.msk.f32.mxu1 %vm7768_vm1, %v7769_v58 }
 0x330   :  { %7369 = vmatprep.subr.bf16.mxu1 %v7767_v17 }
 0x336   :  { %7075 = vmatmul.mubr.f32.vlgmr.msra.gmra.mrb[12].mxu1 %v8493_v46 }
 0x337   :  { %7371 = vmatpush3.bf16.msra.mxu1 %v9108_v27  ;;  %7081 = vmatprep.mubr.msk.f32.mxu1 %vm7768_vm1, %v7769_v58 }
 0x338   :  { %7372 = vmatprep.subr.bf16.mxu1 %v7767_v17 }
 0x33e   :  { %7082 = vmatmul.mubr.f32.vlgmr.msra.gmra.mrb[12].mxu1 %v8496_v56 }
 0x33f   :  { %7374 = vmatpush3.bf16.msra.mxu1 %v8610_v60  ;;  %7088 = vmatprep.mubr.msk.f32.mxu1 %vm7768_vm1, %v7769_v58 }
 0x340   :  { %7375 = vmatprep.subr.bf16.mxu1 %v7767_v17 }
 0x346   :  { %7089 = vmatmul.mubr.f32.vlgmr.msra.gmra.mrb[12].mxu1 %v8499_v59 }
 0x347   :  { %7377 = vmatpush3.bf16.msra.mxu1 %v8634_v54  ;;  %7095 = vmatprep.mubr.msk.f32.mxu1 %vm7768_vm1, %v7769_v58 }
 0x348   :  { %7378 = vmatprep.subr.bf16.mxu1 %v7767_v17 }
 0x34d   :  { %v8875_v42 = vpop.f32.mrb[2].mxu1 }
 0x34e   :  { %v6894_v44 = vpop.f32.mrb[3].mxu1  ;;  %7096 = vmatmul.mubr.f32.vlgmr.msra.gmra.mrb[12].mxu1 %v8493_v46  ;;  %v6249_v4 = vmul.f32 2.0, %v8875_v42  ;;  %v6225_v37 = vmul.f32 %v8875_v42, %v8875_v42 }
 0x34f   :  { %7380 = vmatpush3.bf16.msra.mxu1 %v8610_v60  ;;  %7102 = vmatprep.mubr.msk.f32.mxu1 %vm7768_vm1, %v7769_v58 }
 0x350   :  { %7381 = vmatprep.subr.bf16.mxu1 %v7767_v17 }
 0x356   :  { %7103 = vmatmul.mubr.f32.vlgmr.msra.gmra.mrb[12].mxu1 %v8493_v46 }
 0x357   :  { %7383 = vmatpush3.bf16.msra.mxu1 %v8626_v25  ;;  %7109 = vmatprep.mubr.msk.f32.mxu1 %vm7768_vm1, %v7769_v58 }
 0x358   :  { %7384 = vmatprep.subr.bf16.mxu1 %v7767_v17 }
 0x35a   :  { %7110 = vmatmul.mubr.f32.vlgmr.msra.gmra.mrb[14].mxu1 %v8510_v40 }
 0x35b   :  { %7386 = vmatpush3.bf16.msra.mxu1 %v8667_v8  ;;  %7116 = vmatprep.mubr.msk.f32.mxu1 %vm7768_vm1, %v7769_v58 }
 0x35c   :  { %7387 = vmatprep.subr.bf16.mxu1 %v7767_v17 }
 0x362   :  { %7117 = vmatmul.mubr.f32.vlgmr.msra.gmra.mrb[14].mxu1 %v8493_v46 }
 0x363   :  { %7389 = vmatpush3.bf16.msra.mxu1 %v9109_v49  ;;  %7123 = vmatprep.mubr.msk.f32.mxu1 %vm7768_vm1, %v7769_v58 }
 0x364   :  { %7390 = vmatprep.subr.bf16.mxu1 %v7767_v17 }
 0x36a   :  { %7124 = vmatmul.mubr.f32.vlgmr.msra.gmra.mrb[14].mxu1 %v8496_v56 }
 0x36b   :  { %7392 = vmatpush3.bf16.msra.mxu1 %v8626_v25  ;;  %7130 = vmatprep.mubr.msk.f32.mxu1 %vm7768_vm1, %v7769_v58 }
 0x36c   :  { %7393 = vmatprep.subr.bf16.mxu1 %v7767_v17 }
 0x372   :  { %7131 = vmatmul.mubr.f32.vlgmr.msra.gmra.mrb[14].mxu1 %v8499_v59 }
 0x373   :  { %7395 = vmatpush3.bf16.msra.mxu1 %v8654_v20  ;;  %7137 = vmatprep.mubr.msk.f32.mxu1 %vm7768_vm1, %v7769_v58 }
 0x374   :  { %7396 = vmatprep.subr.bf16.mxu1 %v7767_v17 }
 0x379   :  { %v3007_v53 = vpop.f32.mrb[4].mxu1 }
 0x37a   :  { %v8909_v41 = vmul.f32 %v6248_v28, %v3007_v53  ;;  %v6936_v52 = vpop.f32.mrb[5].mxu1  ;;  %7138 = vmatmul.mubr.f32.vlgmr.msra.gmra.mrb[14].mxu1 %v8493_v46  ;;  %v8914_v8 = vmul.f32 %v3007_v53, %v3007_v53  ;;  %v8916_v55 = vmul.f32 %v3007_v53, %v2089_v36 }
 0x37b   :  { %7398 = vmatpush3.bf16.msra.mxu1 %v8626_v25  ;;  %7144 = vmatprep.mubr.msk.f32.mxu1 %vm7768_vm1, %v7769_v58 }
 0x37c   :  { %7399 = vmatprep.subr.bf16.mxu1 %v7767_v17  ;;  %v8924_v2 = vadd.f32 %v8914_v8, %v8912_v15  ;;  %v6252_v3 = vadd.f32 0.0001, %v8909_v41 }
 0x37e   :  { %v6258_v63 = vadd.f32 0.0001, %v8924_v2 }
 0x382   :  { %7145 = vmatmul.mubr.f32.vlgmr.msra.gmra.mrb[14].mxu1 %v8493_v46 }
 0x383   :  { %7401 = vmatpush3.bf16.msra.mxu1 %v8647_v21  ;;  %7151 = vmatprep.mubr.msk.f32.mxu1 %vm7768_vm1, %v7769_v58 }
 0x384   :  { %7402 = vmatprep.subr.bf16.mxu1 %v7767_v17 }
 0x386   :  { %7152 = vmatmul.mubr.f32.vlgmr.msra.gmra.mrb[16].mxu1 %v8510_v40 }
 0x387   :  { %7404 = vmatpush3.bf16.msra.mxu1 %v8684_v6  ;;  %7158 = vmatprep.mubr.msk.f32.mxu1 %vm7768_vm1, %v7769_v58 }
 0x388   :  { %7405 = vmatprep.subr.bf16.mxu1 %v7767_v17 }
 0x38e   :  { %7159 = vmatmul.mubr.f32.vlgmr.msra.gmra.mrb[16].mxu1 %v8493_v46 }
 0x38f   :  { %7407 = vmatpush3.bf16.msra.mxu1 %v9110_v39  ;;  %7165 = vmatprep.mubr.msk.f32.mxu1 %vm7768_vm1, %v7769_v58 }
 0x390   :  { %7408 = vmatprep.subr.bf16.mxu1 %v7767_v17 }
 0x396   :  { %7166 = vmatmul.mubr.f32.vlgmr.msra.gmra.mrb[16].mxu1 %v8496_v56 }
 0x397   :  { %7410 = vmatpush3.bf16.msra.mxu1 %v8647_v21  ;;  %7172 = vmatprep.mubr.msk.f32.mxu1 %vm7768_vm1, %v7769_v58 }
 0x398   :  { %7411 = vmatprep.subr.bf16.mxu1 %v7767_v17 }
 0x39e   :  { %7173 = vmatmul.mubr.f32.vlgmr.msra.gmra.mrb[16].mxu1 %v8499_v59 }
 0x39f   :  { %7413 = vmatpush3.bf16.msra.mxu1 %v8671_v9  ;;  %7179 = vmatprep.mubr.msk.f32.mxu1 %vm7768_vm1, %v7769_v58 }
 0x3a0   :  { %7414 = vmatprep.subr.bf16.mxu1 %v7767_v17 }
 0x3a5   :  { %v3466_v1 = vpop.f32.mrb[6].mxu1 }
 0x3a6   :  { %v8954_v61 = vmul.f32 %v6249_v4, %v3466_v1  ;;  %v6978_v16 = vpop.f32.mrb[7].mxu1  ;;  %7180 = vmatmul.mubr.f32.vlgmr.msra.gmra.mrb[16].mxu1 %v8493_v46  ;;  %v6229_v34 = vmul.f32 %v3466_v1, %v3466_v1  ;;  %v8960_v51 = vmul.f32 %v3466_v1, %v8875_v42 }
 0x3a7   :  { %7416 = vmatpush3.bf16.msra.mxu1 %v8647_v21  ;;  %7186 = vmatprep.mubr.msk.f32.mxu1 %vm7768_vm1, %v7769_v58 }
 0x3a8   :  { %7417 = vmatprep.subr.bf16.mxu1 %v7767_v17  ;;  %v6257_v43 = vadd.f32 %v6229_v34, %v6225_v37  ;;  %v6253_v26 = vadd.f32 0.0001, %v8954_v61 }
 0x3aa   :  { %v6259_v9 = vadd.f32 0.0001, %v6257_v43 }
 0x3ae   :  { %7187 = vmatmul.mubr.f32.vlgmr.msra.gmra.mrb[16].mxu1 %v8493_v46 }
 0x3af   :  { %7419 = vmatpush3.bf16.msra.mxu1 %v8663_v10  ;;  %7193 = vmatprep.mubr.msk.f32.mxu1 %vm7768_vm1, %v7769_v58 }
 0x3b0   :  { %7420 = vmatprep.subr.bf16.mxu1 %v7767_v17 }
 0x3b2   :  { %7194 = vmatmul.mubr.f32.vlgmr.msra.gmra.mrb[18].mxu1 %v8510_v40 }
 0x3b3   :  { %7422 = vmatpush3.bf16.msra.mxu1 %v8686_v32  ;;  %7200 = vmatprep.mubr.msk.f32.mxu1 %vm7768_vm1, %v7769_v58 }
 0x3b4   :  { %7423 = vmatprep.subr.bf16.mxu1 %v7767_v17 }
 0x3ba   :  { %7201 = vmatmul.mubr.f32.vlgmr.msra.gmra.mrb[18].mxu1 %v8493_v46 }
 0x3bb   :  { %7425 = vmatpush3.bf16.msra.mxu1 %v7424_v47  ;;  %7207 = vmatprep.mubr.msk.f32.mxu1 %vm7768_vm1, %v7769_v58 }
 0x3bc   :  { %7426 = vmatprep.subr.bf16.mxu1 %v7767_v17 }
 0x3c2   :  { %7208 = vmatmul.mubr.f32.vlgmr.msra.gmra.mrb[18].mxu1 %v8496_v56 }
 0x3c3   :  { %7428 = vmatpush3.bf16.msra.mxu1 %v8663_v10  ;;  %7214 = vmatprep.mubr.msk.f32.mxu1 %vm7768_vm1, %v7769_v58 }
 0x3c4   :  { %7429 = vmatprep.subr.bf16.mxu1 %v7767_v17 }
 0x3ca   :  { %7215 = vmatmul.mubr.f32.vlgmr.msra.gmra.mrb[18].mxu1 %v8499_v59 }
 0x3cb   :  { %7431 = vmatpush3.bf16.msra.mxu1 %v8682_v5  ;;  %7221 = vmatprep.mubr.msk.f32.mxu1 %vm7768_vm1, %v7769_v58 }
 0x3cc   :  { %7432 = vmatprep.subr.bf16.mxu1 %v7767_v17 }
 0x3d1   :  { %v3925_v40 = vpop.f32.mrb[8].mxu1 }
 0x3d2   :  { %v6226_v18 = vsub.f32 %v3925_v40, %v8912_v15  ;;  %v7020_v56 = vpop.f32.mrb[9].mxu1  ;;  %7222 = vmatmul.mubr.f32.vlgmr.msra.gmra.mrb[18].mxu1 %v8493_v46 }
 0x3d3   :  { %7434 = vmatpush3.bf16.msra.mxu1 %v8663_v10  ;;  %7228 = vmatprep.mubr.msk.f32.mxu1 %vm7768_vm1, %v7769_v58 }
 0x3da   :  { %7229 = vmatmul.mubr.f32.vlgmr.msra.gmra.mrb[18].mxu1 %v8493_v46 }
 0x3fd   :  { %v4384_v59 = vpop.f32.mrb[10].mxu1 }
 0x3fe   :  { %v6227_v60 = vsub.f32 %v4384_v59, %v6225_v37  ;;  %v7062_v11 = vpop.f32.mrb[11].mxu1 }
 0x429   :  { %v4843_v19 = vpop.f32.mrb[12].mxu1 }
 0x42a   :  { %v6230_v7 = vsub.f32 %v4843_v19, %v8914_v8  ;;  %v7104_v17 = vpop.f32.mrb[13].mxu1 }
 0x42c   :  { %v6240_v20 = vadd.f32 %v6230_v7, %v6226_v18 }
 0x42e   :  { %v6242_v54 = vadd.f32 0.0009, %v6240_v20 }
 0x430   :  { %7647 = vrcp.f32 %v6242_v54 }
 0x431   :  { %7649 = vrcp.f32 %v6258_v63 }
 0x43a   :  { %v7648_v48 = vpop.eup %7647 }
 0x43b   :  { %v7650_v50 = vpop.eup %7649 }
 0x455   :  { %v5302_v62 = vpop.f32.mrb[14].mxu1 }
 0x456   :  { %v6231_v25 = vsub.f32 %v5302_v62, %v6229_v34  ;;  %v7146_v35 = vpop.f32.mrb[15].mxu1 }
 0x458   :  { %v6241_v57 = vadd.f32 %v6231_v25, %v6227_v60 }
 0x45a   :  { %v6243_v29 = vadd.f32 0.0009, %v6241_v57 }
 0x45c   :  { %7651 = vrcp.f32 %v6243_v29 }
 0x45d   :  { %7653 = vrcp.f32 %v6259_v9 }
 0x466   :  { %v7652_v12 = vpop.eup %7651 }
 0x467   :  { %v7654_v24 = vpop.eup %7653 }
 0x481   :  { %v5761_v58 = vpop.f32.mrb[16].mxu1 }
 0x482   :  { %v6234_v46 = vsub.f32 %v5761_v58, %v8916_v55  ;;  %v7188_v21 = vpop.f32.mrb[17].mxu1 }
 0x484   :  { %v6236_v13 = vmul.f32 2.0, %v6234_v46 }
 0x486   :  { %v6238_v0 = vadd.f32 0.0009, %v6236_v13 }
 0x488   :  { %v6245_v45 = vmul.f32 %v7648_v48, %v6238_v0 }
 0x48a   :  { %v6254_v10 = vmul.f32 %v6252_v3, %v6245_v45 }
 0x48c   :  { %v6261_v22 = vmul.f32 %v7650_v50, %v6254_v10 }
 0x48e   :  { %v6265_v23 = vsel %vm6264_vm2, %v6261_v22, 0.0 }
 0x4ad   :  { %v6220_v47 = vpop.f32.mrb[18].mxu1 }
 0x4ae   :  { %v6235_v30 = vsub.f32 %v6220_v47, %v8960_v51  ;;  %v7230_v14 = vpop.f32.mrb[19].mxu1 }
 0x4b0   :  { %v6237_v5 = vmul.f32 2.0, %v6235_v30 }
 0x4b2   :  { %v6239_v6 = vadd.f32 0.0009, %v6237_v5 }
 0x4b4   :  { %v6247_v32 = vmul.f32 %v7652_v12, %v6239_v6 }
 0x4b6   :  { %v6255_v33 = vmul.f32 %v6253_v26, %v6247_v32 }
 0x4b8   :  { %v6263_v31 = vmul.f32 %v7654_v24, %v6255_v33 }
 0x4ba   :  { %v6266_v36 = vsel %vm6264_vm2, %v6263_v31, 0.0 }
 0x4bb   :  { %v6267_v38 = vadd.f32 %v6266_v36, %v6265_v23 }
 0x4bd   :  { %6268 = vadd.xlane.f32.xlu0 %v6267_v38 }
 0x54a   :  { %v6269_v27 = vpop.xlane.xlu0 %6268 }
 0x54b   :  { %v6270_v42 = vrot.slane %v6269_v27, 4 }
 0x54d   :  { %v6271_v44 = vadd.f32 %v6270_v42, %v6269_v27 }
 0x54f   :  { %v6272_v49 = vrot.slane %v6271_v44, 2 }
 0x551   :  { %v6273_v28 = vadd.f32 %v6272_v49, %v6271_v44 }
 0x553   :  { %v6274_v53 = vrot.slane %v6273_v28, 1 }
 0x555   :  { %v6275_v41 = vadd.f32 %v6274_v53, %v6273_v28 }
 0x557   :  { %7635 = vpush %v6275_v41 }
 0x588   :  { %s7636_s3 = spop %7635 }
 0x589   :  { %6278 = sst [smem:[#allocation10]] %s7636_s3 }
 0x58a   :  { %7752 = shalt.err (!%p7749_p6)
}
 0x58b   :  { %s7770_s16 = smov [#allocation10]  }
 0x58c   :  { %6286 = dma.smem_to_hbm %s7770_s16, 16, %s9021_s4, [#allocation4]  }
 0x58d   :  { %7759 = dma.done.wait [#allocation4], 16  }
 0x58e   :  { %7760 = vsyncadd [#allocation4], 4294967280 }
 0x58f   :  { %6290 = sfence }
 0x590   :  { %6291 = vsyncpa [#allocation3], 1 }
 0x591   :  { %6292 = vsyncpa [#allocation6], 1 }
 0x592   :  { %6293 = vsyncpa [#allocation9], 1 }
 0x593   :  { %6294 = vsyncpa [#allocation4], 1 }

</bundles_post_ra>
